<compile_context>
chip_gen: v6e
topology: v6e:2x2x1
jax: 0.10.0
libtpu: 0.0.40
codegen_flags: <defaults>
</compile_context>

<pallas_src>
import jax
import jax.numpy as jnp
from jax.experimental import pallas as pl
from jax.experimental.pallas import tpu as pltpu


def _round_up(x, m):
    return (x + m - 1) // m * m


def _lstm_kernel(len_ref, x_ref, w_ih_ref, w_hh_ref, b_ref, w_fc_ref, b_fc_ref,
                 out_ref, h_sc, c_sc, xw_sc):
    """One grid step = one batch block x one chunk of TT timesteps.

    len_ref : (TB, 1)       int32  sequence lengths for this batch block
    x_ref   : (TT*TB, Ep)   bf16   embedded chunk, rows ordered [t, j] (time-major in block)
    w_ih_ref: (Ep, 4Hp)     bf16   input->gate weights, PyTorch gate order i,f,g,o
    w_hh_ref: (Hp, 4Hp)     bf16   hidden->gate weights
    b_ref   : (1, 4Hp)      f32    b_ih + b_hh
    w_fc_ref: (Hp, Cp)      bf16
    b_fc_ref: (1, Cp)       f32
    h_sc/c_sc: (TB, Hp)     f32    recurrent state carried across time chunks
    xw_sc   : (TT*TB, 4Hp)  f32    precomputed x@W_ih + b for the whole chunk
    """
    t_idx = pl.program_id(1)
    TB, Hp = h_sc.shape
    TT = xw_sc.shape[0] // TB

    @pl.when(t_idx == 0)
    def _():
        h_sc[...] = jnp.zeros_like(h_sc)
        c_sc[...] = jnp.zeros_like(c_sc)

    # Input contribution for ALL TT timesteps in one big MXU dot (M = TT*TB); bias folded in
    # here so nothing but h@W_hh + elementwise gates sits on the serial recurrent path.
    xw_sc[...] = (jnp.dot(x_ref[...], w_ih_ref[...],
                          preferred_element_type=jnp.float32) + b_ref[...])

    lens = len_ref[...]              # (TB, 1) int32, read once per chunk
    w_hh = w_hh_ref[...]             # hoist the weight load out of the loop
    t0 = t_idx * TT

    def sigmoid(z):                  # divide -> EUP vrcp (approx), off the VALU slot
        return pl.reciprocal(1.0 + jnp.exp(-z), approx=True)

    def step(k, carry):
        h, c = carry                 # f32 (TB, Hp)
        row0 = pl.multiple_of(k * TB, TB)
        gates = xw_sc[pl.ds(row0, TB), :] + jnp.dot(
            h.astype(jnp.bfloat16), w_hh, preferred_element_type=jnp.float32)
        i_g = sigmoid(gates[:, 0 * Hp:1 * Hp])
        f_g = sigmoid(gates[:, 1 * Hp:2 * Hp])
        g_g = jnp.tanh(gates[:, 2 * Hp:3 * Hp])
        o_g = sigmoid(gates[:, 3 * Hp:4 * Hp])
        c_new = f_g * c + i_g * g_g
        h_new = o_g * jnp.tanh(c_new)
        # pack_padded_sequence semantics: freeze state once t >= length
        mask = (t0 + k) < lens       # (TB, 1) bool
        return jnp.where(mask, h_new, h), jnp.where(mask, c_new, c)

    h, c = jax.lax.fori_loop(0, TT, step, (h_sc[...], c_sc[...]),
                             unroll=min(TT, 8))
    h_sc[...] = h
    c_sc[...] = c

    @pl.when(t_idx == pl.num_programs(1) - 1)
    def _():
        # dropout is identity in eval; fc: logits = h @ W_fc + b_fc
        out_ref[...] = (jnp.dot(h.astype(jnp.bfloat16), w_fc_ref[...],
                                preferred_element_type=jnp.float32) + b_fc_ref[...])


def lstm_pallas(text, lengths, params):
    emb_table = params["embedding"]   # (V, E)
    w_ih = params["w_ih"]             # (E, 4H)  (transposed PyTorch weight_ih_l0)
    w_hh = params["w_hh"]             # (H, 4H)  (transposed PyTorch weight_hh_l0)
    b = params["b"]                   # (1, 4H)  (b_ih + b_hh)
    w_fc = params["w_fc"]             # (H, C)   (transposed PyTorch fc.weight)
    b_fc = params["b_fc"]             # (1, C)

    B, T = text.shape
    E = emb_table.shape[1]
    H = w_hh.shape[0]
    C = w_fc.shape[1]

    # --- hardware-aligned padded sizes ---
    Ep = _round_up(E, 128)            # lane-aligned
    Hp = _round_up(H, 128)            # lane-aligned gate slices
    Cp = _round_up(C, 128)            # lane-dense output stores
    Bp = _round_up(B, 16)             # bf16 sublane packing (16 rows per tile)
    TB = min(Bp, 128)                 # batch rows per grid block ("parallel" axis)
    Bp = _round_up(Bp, TB)
    NB = Bp // TB

    # Trim the time axis to the longest real sequence (skip dead padded steps).
    # NOTE: under jit the lengths are traced -> fall back to full T (correct, just slower).
    try:
        T_eff = max(1, min(T, int(jnp.max(lengths))))
    except Exception:
        T_eff = T

    # Timesteps per grid step: big enough to amortize per-grid-step overhead, bounded by a
    # conservative VMEM budget (double-buffered bf16 x chunk + f32 xw scratch) so the kernel
    # also fits v5e's 16 MiB default scoped VMEM at realistic batch/embed sizes.
    bytes_per_t = TB * (2 * Ep * 2 + 4 * Hp * 4)
    TT = int(max(1, min(T_eff, 32, (8 << 20) // max(bytes_per_t, 1))))
    Tp = _round_up(T_eff, TT)
    n_chunks = Tp // TT

    # --- pad parameters (per-gate along the 4H axis; gate order i,f,g,o preserved) ---
    def pad_gates(w, in_dim, in_pad):     # (in_dim, 4H) -> (in_pad, 4*Hp)
        w4 = w.reshape(in_dim, 4, H)
        w4 = jnp.pad(w4, ((0, in_pad - in_dim), (0, 0), (0, Hp - H)))
        return w4.reshape(in_pad, 4 * Hp)

    w_ih_p = pad_gates(w_ih, E, Ep).astype(jnp.bfloat16)                        # (Ep, 4Hp)
    w_hh_p = pad_gates(w_hh, H, Hp).astype(jnp.bfloat16)                        # (Hp, 4Hp)
    b_p = pad_gates(b, 1, 1).astype(jnp.float32)                                # (1, 4Hp)
    w_fc_p = jnp.pad(w_fc, ((0, Hp - H), (0, Cp - C))).astype(jnp.bfloat16)     # (Hp, Cp)
    b_fc_p = jnp.pad(b_fc, ((0, 0), (0, Cp - C))).astype(jnp.float32)           # (1, Cp)

    # --- embedding gather directly into the kernel's layout:
    #     batch-block-major, time-major inside the block, flattened 2-D.
    emb_p = jnp.pad(emb_table, ((0, 0), (0, Ep - E))).astype(jnp.bfloat16)      # (V, Ep)
    text_p = jnp.pad(text[:, :T_eff], ((0, Bp - B), (0, Tp - T_eff)))           # (Bp, Tp)
    tok = text_p.reshape(NB, TB, Tp).transpose(0, 2, 1).reshape(NB * Tp * TB)
    x_flat = jnp.take(emb_p, tok, axis=0)                                       # (NB*Tp*TB, Ep)

    len_p = jnp.pad(lengths.astype(jnp.int32), (0, Bp - B)).reshape(Bp, 1)      # padded rows: 0

    out = pl.pallas_call(
        _lstm_kernel,
        out_shape=jax.ShapeDtypeStruct((Bp, Cp), jnp.float32),
        grid=(NB, n_chunks),
        in_specs=[
            pl.BlockSpec((TB, 1), lambda bb, t: (bb, 0)),                       # lengths
            pl.BlockSpec((TT * TB, Ep), lambda bb, t: (bb * n_chunks + t, 0)),  # x chunk
            pl.BlockSpec((Ep, 4 * Hp), lambda bb, t: (0, 0)),                   # W_ih
            pl.BlockSpec((Hp, 4 * Hp), lambda bb, t: (0, 0)),                   # W_hh
            pl.BlockSpec((1, 4 * Hp), lambda bb, t: (0, 0)),                    # b
            pl.BlockSpec((Hp, Cp), lambda bb, t: (0, 0)),                       # W_fc
            pl.BlockSpec((1, Cp), lambda bb, t: (0, 0)),                        # b_fc
        ],
        out_specs=pl.BlockSpec((TB, Cp), lambda bb, t: (bb, 0)),
        scratch_shapes=[
            pltpu.VMEM((TB, Hp), jnp.float32),              # h state
            pltpu.VMEM((TB, Hp), jnp.float32),              # c state
            pltpu.VMEM((TT * TB, 4 * Hp), jnp.float32),     # precomputed x@W_ih + b
        ],
        compiler_params=pltpu.CompilerParams(
            # batch blocks are independent -> megacore/2-TC sharding;
            # time axis is serial (carried h/c state).
            dimension_semantics=("parallel", "arbitrary")),
    )(len_p, x_flat, w_ih_p, w_hh_p, b_p, w_fc_p, b_fc_p)

    return out[:B, :C]


def lstm_ref(text, lengths, params):
    """Pure-JAX f32 reference of the same forward pass (eval-mode dropout)."""
    emb = jnp.take(params["embedding"], text, axis=0)    # (B, T, E)
    B, T, _ = emb.shape
    H = params["w_hh"].shape[0]
    h0 = jnp.zeros((B, H), jnp.float32)
    c0 = jnp.zeros((B, H), jnp.float32)

    def step(carry, inp):
        h, c = carry
        x_t, t = inp
        gates = x_t @ params["w_ih"] + h @ params["w_hh"] + params["b"]
        i_g = jax.nn.sigmoid(gates[:, 0:H])
        f_g = jax.nn.sigmoid(gates[:, H:2 * H])
        g_g = jnp.tanh(gates[:, 2 * H:3 * H])
        o_g = jax.nn.sigmoid(gates[:, 3 * H:4 * H])
        c_new = f_g * c + i_g * g_g
        h_new = o_g * jnp.tanh(c_new)
        m = (t < lengths)[:, None]
        return (jnp.where(m, h_new, h), jnp.where(m, c_new, c)), None

    (h, _), _ = jax.lax.scan(step, (h0, c0),
                             (jnp.swapaxes(emb, 0, 1), jnp.arange(T)))
    return h @ params["w_fc"] + params["b_fc"]


if __name__ == "__main__":
    # small shapes consistent with the module
    VOCAB, EMBED, HIDDEN, NUM_CLASS = 50, 16, 32, 4
    B, T = 2, 8

    key = jax.random.PRNGKey(0)
    ks = jax.random.split(key, 8)
    params = {
        "embedding": jax.random.normal(ks[0], (VOCAB, EMBED), jnp.float32) * 0.1,
        "w_ih": jax.random.normal(ks[1], (EMBED, 4 * HIDDEN), jnp.float32) * 0.1,
        "w_hh": jax.random.normal(ks[2], (HIDDEN, 4 * HIDDEN), jnp.float32) * 0.1,
        "b": (jax.random.normal(ks[3], (1, 4 * HIDDEN), jnp.float32) * 0.1
              + jax.random.normal(ks[4], (1, 4 * HIDDEN), jnp.float32) * 0.1),
        "w_fc": jax.random.normal(ks[5], (HIDDEN, NUM_CLASS), jnp.float32) * 0.1,
        "b_fc": jax.random.normal(ks[6], (1, NUM_CLASS), jnp.float32) * 0.1,
    }

    text = jax.random.randint(ks[7], (B, T), 0, VOCAB, dtype=jnp.int32)
    lengths = jnp.array([T, 5], dtype=jnp.int32)   # variable lengths (<= T)

    out = jax.block_until_ready(lstm_pallas(text, lengths, params))
    ref = jax.block_until_ready(lstm_ref(text, lengths, params))

    assert out.shape == (B, NUM_CLASS), out.shape
    # bf16 MXU operands (f32 accumulation / f32 recurrence) -> slightly looser tolerance
    assert jnp.allclose(out, ref, atol=2e-2, rtol=2e-2), (out, ref)
    print("KERNEL_OK")
</pallas_src>

<mosaic_0001>
module attributes {stable_mosaic.version = 11 : i64} {
  func.func @_lstm_kernel(%arg0: i32, %arg1: i32, %arg2: memref<16x1xi32, #tpu.memory_space<vmem>>, %arg3: memref<128x128xbf16, #tpu.memory_space<vmem>>, %arg4: memref<128x512xbf16, #tpu.memory_space<vmem>>, %arg5: memref<128x512xbf16, #tpu.memory_space<vmem>>, %arg6: memref<1x512xf32, #tpu.memory_space<vmem>>, %arg7: memref<128x128xbf16, #tpu.memory_space<vmem>>, %arg8: memref<1x128xf32, #tpu.memory_space<vmem>>, %arg9: memref<16x128xf32, #tpu.memory_space<vmem>>, %arg10: memref<16x128xf32, #tpu.memory_space<vmem>>, %arg11: memref<16x128xf32, #tpu.memory_space<vmem>>, %arg12: memref<128x512xf32, #tpu.memory_space<vmem>>) attributes {dimension_semantics = [#tpu.dimension_semantics<parallel>, #tpu.dimension_semantics<arbitrary>], iteration_bounds = array<i64: 1, 1>, scalar_prefetch = 0 : i64, scratch_operands = 3 : i64, tpu.core_type = #tpu.core_type<tc>, window_params = [{transform_indices = @transform_0, window_bounds = array<i64: 16, 1>}, {transform_indices = @transform_1, window_bounds = array<i64: 128, 128>}, {pipeline_mode = #tpu.pipeline_mode<synchronous>, transform_indices = @transform_2, window_bounds = array<i64: 128, 512>}, {pipeline_mode = #tpu.pipeline_mode<synchronous>, transform_indices = @transform_3, window_bounds = array<i64: 128, 512>}, {pipeline_mode = #tpu.pipeline_mode<synchronous>, transform_indices = @transform_4, window_bounds = array<i64: 1, 512>}, {pipeline_mode = #tpu.pipeline_mode<synchronous>, transform_indices = @transform_5, window_bounds = array<i64: 128, 128>}, {pipeline_mode = #tpu.pipeline_mode<synchronous>, transform_indices = @transform_6, window_bounds = array<i64: 1, 128>}, {transform_indices = @transform_7, window_bounds = array<i64: 16, 128>}]} {
    %c0_i32 = arith.constant 0 : i32
    %0 = arith.cmpi eq, %arg1, %c0_i32 : i32
    %1 = arith.extui %0 : i1 to i32
    %c0_i32_0 = arith.constant 0 : i32
    %2 = arith.cmpi ne, %1, %c0_i32_0 : i32
    scf.if %2 {
      %cst_95 = arith.constant 0.000000e+00 : f32
      %372 = vector.broadcast %cst_95 : f32 to vector<16x128xf32>
      %c0_96 = arith.constant 0 : index
      %c0_97 = arith.constant 0 : index
      %373 = vector.load %arg10[%c0_96, %c0_97] : memref<16x128xf32, #tpu.memory_space<vmem>>, vector<16x128xf32>
      tpu.vector_store %arg10[%c0_96, %c0_97], %372 {strides = array<i32>} : memref<16x128xf32, #tpu.memory_space<vmem>>, vector<16x128xf32>,
      %cst_98 = arith.constant 0.000000e+00 : f32
      %374 = vector.broadcast %cst_98 : f32 to vector<16x128xf32>
      %c0_99 = arith.constant 0 : index
      %c0_100 = arith.constant 0 : index
      %375 = vector.load %arg11[%c0_99, %c0_100] : memref<16x128xf32, #tpu.memory_space<vmem>>, vector<16x128xf32>
      tpu.vector_store %arg11[%c0_99, %c0_100], %374 {strides = array<i32>} : memref<16x128xf32, #tpu.memory_space<vmem>>, vector<16x128xf32>,
    } else {
    }
    %c0 = arith.constant 0 : index
    %c0_1 = arith.constant 0 : index
    %3 = vector.load %arg3[%c0, %c0_1] : memref<128x128xbf16, #tpu.memory_space<vmem>>, vector<128x128xbf16>
    %c0_2 = arith.constant 0 : index
    %c0_3 = arith.constant 0 : index
    %4 = vector.load %arg4[%c0_2, %c0_3] : memref<128x512xbf16, #tpu.memory_space<vmem>>, vector<128x512xbf16>
    %cst = arith.constant dense<0.000000e+00> : vector<128x512xf32>
    %5 = tpu.matmul %3, %4, %cst {dimension_numbers = #tpu.dot_dimension_numbers<[1], [0], [0], [1], [0, 0, 1, 1], [], []>} : vector<128x128xbf16>, vector<128x512xbf16>, vector<128x512xf32> -> vector<128x512xf32>
    %c0_4 = arith.constant 0 : index
    %c0_5 = arith.constant 0 : index
    %6 = vector.load %arg6[%c0_4, %c0_5] : memref<1x512xf32, #tpu.memory_space<vmem>>, vector<1x512xf32>
    %7 = vector.broadcast %6 : vector<1x512xf32> to vector<128x512xf32>
    %8 = arith.addf %5, %7 : vector<128x512xf32>
    %c0_6 = arith.constant 0 : index
    %c0_7 = arith.constant 0 : index
    %9 = vector.load %arg12[%c0_6, %c0_7] : memref<128x512xf32, #tpu.memory_space<vmem>>, vector<128x512xf32>
    tpu.vector_store %arg12[%c0_6, %c0_7], %8 {strides = array<i32>} : memref<128x512xf32, #tpu.memory_space<vmem>>, vector<128x512xf32>,
    %c0_8 = arith.constant 0 : index
    %c0_9 = arith.constant 0 : index
    %10 = vector.load %arg2[%c0_8, %c0_9] : memref<16x1xi32, #tpu.memory_space<vmem>>, vector<16x1xi32>
    %c0_10 = arith.constant 0 : index
    %c0_11 = arith.constant 0 : index
    %11 = vector.load %arg5[%c0_10, %c0_11] : memref<128x512xbf16, #tpu.memory_space<vmem>>, vector<128x512xbf16>
    %c8_i32 = arith.constant 8 : i32
    %12 = arith.muli %arg1, %c8_i32 : i32
    %c0_12 = arith.constant 0 : index
    %c0_13 = arith.constant 0 : index
    %13 = vector.load %arg10[%c0_12, %c0_13] : memref<16x128xf32, #tpu.memory_space<vmem>>, vector<16x128xf32>
    %c0_14 = arith.constant 0 : index
    %c0_15 = arith.constant 0 : index
    %14 = vector.load %arg11[%c0_14, %c0_15] : memref<16x128xf32, #tpu.memory_space<vmem>>, vector<16x128xf32>
    %c0_i32_16 = arith.constant 0 : i32
    %c16_i32 = arith.constant 16 : i32
    %15 = arith.muli %c0_i32_16, %c16_i32 : i32
    %16 = tpu.assume_multiple %15, 16 : i32
    %17 = arith.index_cast %16 : i32 to index
    %c0_17 = arith.constant 0 : index
    %18 = vector.load %arg12[%17, %c0_17] : memref<128x512xf32, #tpu.memory_space<vmem>>, vector<16x512xf32>
    %19 = arith.truncf %13 : vector<16x128xf32> to vector<16x128xbf16>
    %cst_18 = arith.constant dense<0.000000e+00> : vector<16x512xf32>
    %20 = tpu.matmul %19, %11, %cst_18 {dimension_numbers = #tpu.dot_dimension_numbers<[1], [0], [0], [1], [0, 0, 1, 1], [], []>} : vector<16x128xbf16>, vector<128x512xbf16>, vector<16x512xf32> -> vector<16x512xf32>
    %21 = arith.addf %18, %20 : vector<16x512xf32>
    %22 = vector.extract_strided_slice %21 {offsets = [0, 0], sizes = [16, 128], strides = [1, 1]} : vector<16x512xf32> to vector<16x128xf32>
    %cst_19 = arith.constant 0.000000e+00 : f32
    %23 = vector.broadcast %cst_19 : f32 to vector<16x128xf32>
    %24 = arith.subf %23, %22 : vector<16x128xf32>
    %25 = math.exp %24 : vector<16x128xf32>
    %cst_20 = arith.constant 1.000000e+00 : f32
    %26 = vector.broadcast %cst_20 : f32 to vector<16x128xf32>
    %27 = arith.addf %26, %25 : vector<16x128xf32>
    %28 = tpu.reciprocal %27 {approx = true} : vector<16x128xf32> -> vector<16x128xf32>
    %29 = vector.extract_strided_slice %21 {offsets = [0, 128], sizes = [16, 128], strides = [1, 1]} : vector<16x512xf32> to vector<16x128xf32>
    %cst_21 = arith.constant 0.000000e+00 : f32
    %30 = vector.broadcast %cst_21 : f32 to vector<16x128xf32>
    %31 = arith.subf %30, %29 : vector<16x128xf32>
    %32 = math.exp %31 : vector<16x128xf32>
    %cst_22 = arith.constant 1.000000e+00 : f32
    %33 = vector.broadcast %cst_22 : f32 to vector<16x128xf32>
    %34 = arith.addf %33, %32 : vector<16x128xf32>
    %35 = tpu.reciprocal %34 {approx = true} : vector<16x128xf32> -> vector<16x128xf32>
    %36 = vector.extract_strided_slice %21 {offsets = [0, 256], sizes = [16, 128], strides = [1, 1]} : vector<16x512xf32> to vector<16x128xf32>
    %37 = math.tanh %36 : vector<16x128xf32>
    %38 = vector.extract_strided_slice %21 {offsets = [0, 384], sizes = [16, 128], strides = [1, 1]} : vector<16x512xf32> to vector<16x128xf32>
    %cst_23 = arith.constant 0.000000e+00 : f32
    %39 = vector.broadcast %cst_23 : f32 to vector<16x128xf32>
    %40 = arith.subf %39, %38 : vector<16x128xf32>
    %41 = math.exp %40 : vector<16x128xf32>
    %cst_24 = arith.constant 1.000000e+00 : f32
    %42 = vector.broadcast %cst_24 : f32 to vector<16x128xf32>
    %43 = arith.addf %42, %41 : vector<16x128xf32>
    %44 = tpu.reciprocal %43 {approx = true} : vector<16x128xf32> -> vector<16x128xf32>
    %45 = arith.mulf %35, %14 : vector<16x128xf32>
    %46 = arith.mulf %28, %37 : vector<16x128xf32>
    %47 = arith.addf %45, %46 : vector<16x128xf32>
    %48 = math.tanh %47 : vector<16x128xf32>
    %49 = arith.mulf %44, %48 : vector<16x128xf32>
    %50 = arith.addi %12, %c0_i32_16 : i32
    %51 = vector.broadcast %50 : i32 to vector<16x1xi32>
    %52 = arith.cmpi slt, %51, %10 : vector<16x1xi32>
    %53 = vector.shape_cast %52 : vector<16x1xi1> to vector<16x1xi1>
    %54 = vector.broadcast %53 : vector<16x1xi1> to vector<16x128xi1>
    %55 = arith.select %54, %49, %13 : vector<16x128xi1>, vector<16x128xf32>
    %56 = vector.shape_cast %52 : vector<16x1xi1> to vector<16x1xi1>
    %57 = vector.broadcast %56 : vector<16x1xi1> to vector<16x128xi1>
    %58 = arith.select %57, %47, %14 : vector<16x128xi1>, vector<16x128xf32>
    %c1_i32 = arith.constant 1 : i32
    %c16_i32_25 = arith.constant 16 : i32
    %59 = arith.muli %c1_i32, %c16_i32_25 : i32
    %60 = tpu.assume_multiple %59, 16 : i32
    %61 = arith.index_cast %60 : i32 to index
    %c0_26 = arith.constant 0 : index
    %62 = vector.load %arg12[%61, %c0_26] : memref<128x512xf32, #tpu.memory_space<vmem>>, vector<16x512xf32>
    %63 = arith.truncf %55 : vector<16x128xf32> to vector<16x128xbf16>
    %cst_27 = arith.constant dense<0.000000e+00> : vector<16x512xf32>
    %64 = tpu.matmul %63, %11, %cst_27 {dimension_numbers = #tpu.dot_dimension_numbers<[1], [0], [0], [1], [0, 0, 1, 1], [], []>} : vector<16x128xbf16>, vector<128x512xbf16>, vector<16x512xf32> -> vector<16x512xf32>
    %65 = arith.addf %62, %64 : vector<16x512xf32>
    %66 = vector.extract_strided_slice %65 {offsets = [0, 0], sizes = [16, 128], strides = [1, 1]} : vector<16x512xf32> to vector<16x128xf32>
    %cst_28 = arith.constant 0.000000e+00 : f32
    %67 = vector.broadcast %cst_28 : f32 to vector<16x128xf32>
    %68 = arith.subf %67, %66 : vector<16x128xf32>
    %69 = math.exp %68 : vector<16x128xf32>
    %cst_29 = arith.constant 1.000000e+00 : f32
    %70 = vector.broadcast %cst_29 : f32 to vector<16x128xf32>
    %71 = arith.addf %70, %69 : vector<16x128xf32>
    %72 = tpu.reciprocal %71 {approx = true} : vector<16x128xf32> -> vector<16x128xf32>
    %73 = vector.extract_strided_slice %65 {offsets = [0, 128], sizes = [16, 128], strides = [1, 1]} : vector<16x512xf32> to vector<16x128xf32>
    %cst_30 = arith.constant 0.000000e+00 : f32
    %74 = vector.broadcast %cst_30 : f32 to vector<16x128xf32>
    %75 = arith.subf %74, %73 : vector<16x128xf32>
    %76 = math.exp %75 : vector<16x128xf32>
    %cst_31 = arith.constant 1.000000e+00 : f32
    %77 = vector.broadcast %cst_31 : f32 to vector<16x128xf32>
    %78 = arith.addf %77, %76 : vector<16x128xf32>
    %79 = tpu.reciprocal %78 {approx = true} : vector<16x128xf32> -> vector<16x128xf32>
    %80 = vector.extract_strided_slice %65 {offsets = [0, 256], sizes = [16, 128], strides = [1, 1]} : vector<16x512xf32> to vector<16x128xf32>
    %81 = math.tanh %80 : vector<16x128xf32>
    %82 = vector.extract_strided_slice %65 {offsets = [0, 384], sizes = [16, 128], strides = [1, 1]} : vector<16x512xf32> to vector<16x128xf32>
    %cst_32 = arith.constant 0.000000e+00 : f32
    %83 = vector.broadcast %cst_32 : f32 to vector<16x128xf32>
    %84 = arith.subf %83, %82 : vector<16x128xf32>
    %85 = math.exp %84 : vector<16x128xf32>
    %cst_33 = arith.constant 1.000000e+00 : f32
    %86 = vector.broadcast %cst_33 : f32 to vector<16x128xf32>
    %87 = arith.addf %86, %85 : vector<16x128xf32>
    %88 = tpu.reciprocal %87 {approx = true} : vector<16x128xf32> -> vector<16x128xf32>
    %89 = arith.mulf %79, %58 : vector<16x128xf32>
    %90 = arith.mulf %72, %81 : vector<16x128xf32>
    %91 = arith.addf %89, %90 : vector<16x128xf32>
    %92 = math.tanh %91 : vector<16x128xf32>
    %93 = arith.mulf %88, %92 : vector<16x128xf32>
    %94 = arith.addi %12, %c1_i32 : i32
    %95 = vector.broadcast %94 : i32 to vector<16x1xi32>
    %96 = arith.cmpi slt, %95, %10 : vector<16x1xi32>
    %97 = vector.shape_cast %96 : vector<16x1xi1> to vector<16x1xi1>
    %98 = vector.broadcast %97 : vector<16x1xi1> to vector<16x128xi1>
    %99 = arith.select %98, %93, %55 : vector<16x128xi1>, vector<16x128xf32>
    %100 = vector.shape_cast %96 : vector<16x1xi1> to vector<16x1xi1>
    %101 = vector.broadcast %100 : vector<16x1xi1> to vector<16x128xi1>
    %102 = arith.select %101, %91, %58 : vector<16x128xi1>, vector<16x128xf32>
    %c2_i32 = arith.constant 2 : i32
    %c16_i32_34 = arith.constant 16 : i32
    %103 = arith.muli %c2_i32, %c16_i32_34 : i32
    %104 = tpu.assume_multiple %103, 16 : i32
    %105 = arith.index_cast %104 : i32 to index
    %c0_35 = arith.constant 0 : index
    %106 = vector.load %arg12[%105, %c0_35] : memref<128x512xf32, #tpu.memory_space<vmem>>, vector<16x512xf32>
    %107 = arith.truncf %99 : vector<16x128xf32> to vector<16x128xbf16>
    %cst_36 = arith.constant dense<0.000000e+00> : vector<16x512xf32>
    %108 = tpu.matmul %107, %11, %cst_36 {dimension_numbers = #tpu.dot_dimension_numbers<[1], [0], [0], [1], [0, 0, 1, 1], [], []>} : vector<16x128xbf16>, vector<128x512xbf16>, vector<16x512xf32> -> vector<16x512xf32>
    %109 = arith.addf %106, %108 : vector<16x512xf32>
    %110 = vector.extract_strided_slice %109 {offsets = [0, 0], sizes = [16, 128], strides = [1, 1]} : vector<16x512xf32> to vector<16x128xf32>
    %cst_37 = arith.constant 0.000000e+00 : f32
    %111 = vector.broadcast %cst_37 : f32 to vector<16x128xf32>
    %112 = arith.subf %111, %110 : vector<16x128xf32>
    %113 = math.exp %112 : vector<16x128xf32>
    %cst_38 = arith.constant 1.000000e+00 : f32
    %114 = vector.broadcast %cst_38 : f32 to vector<16x128xf32>
    %115 = arith.addf %114, %113 : vector<16x128xf32>
    %116 = tpu.reciprocal %115 {approx = true} : vector<16x128xf32> -> vector<16x128xf32>
    %117 = vector.extract_strided_slice %109 {offsets = [0, 128], sizes = [16, 128], strides = [1, 1]} : vector<16x512xf32> to vector<16x128xf32>
    %cst_39 = arith.constant 0.000000e+00 : f32
    %118 = vector.broadcast %cst_39 : f32 to vector<16x128xf32>
    %119 = arith.subf %118, %117 : vector<16x128xf32>
    %120 = math.exp %119 : vector<16x128xf32>
    %cst_40 = arith.constant 1.000000e+00 : f32
    %121 = vector.broadcast %cst_40 : f32 to vector<16x128xf32>
    %122 = arith.addf %121, %120 : vector<16x128xf32>
    %123 = tpu.reciprocal %122 {approx = true} : vector<16x128xf32> -> vector<16x128xf32>
    %124 = vector.extract_strided_slice %109 {offsets = [0, 256], sizes = [16, 128], strides = [1, 1]} : vector<16x512xf32> to vector<16x128xf32>
    %125 = math.tanh %124 : vector<16x128xf32>
    %126 = vector.extract_strided_slice %109 {offsets = [0, 384], sizes = [16, 128], strides = [1, 1]} : vector<16x512xf32> to vector<16x128xf32>
    %cst_41 = arith.constant 0.000000e+00 : f32
    %127 = vector.broadcast %cst_41 : f32 to vector<16x128xf32>
    %128 = arith.subf %127, %126 : vector<16x128xf32>
    %129 = math.exp %128 : vector<16x128xf32>
    %cst_42 = arith.constant 1.000000e+00 : f32
    %130 = vector.broadcast %cst_42 : f32 to vector<16x128xf32>
    %131 = arith.addf %130, %129 : vector<16x128xf32>
    %132 = tpu.reciprocal %131 {approx = true} : vector<16x128xf32> -> vector<16x128xf32>
    %133 = arith.mulf %123, %102 : vector<16x128xf32>
    %134 = arith.mulf %116, %125 : vector<16x128xf32>
    %135 = arith.addf %133, %134 : vector<16x128xf32>
    %136 = math.tanh %135 : vector<16x128xf32>
    %137 = arith.mulf %132, %136 : vector<16x128xf32>
    %138 = arith.addi %12, %c2_i32 : i32
    %139 = vector.broadcast %138 : i32 to vector<16x1xi32>
    %140 = arith.cmpi slt, %139, %10 : vector<16x1xi32>
    %141 = vector.shape_cast %140 : vector<16x1xi1> to vector<16x1xi1>
    %142 = vector.broadcast %141 : vector<16x1xi1> to vector<16x128xi1>
    %143 = arith.select %142, %137, %99 : vector<16x128xi1>, vector<16x128xf32>
    %144 = vector.shape_cast %140 : vector<16x1xi1> to vector<16x1xi1>
    %145 = vector.broadcast %144 : vector<16x1xi1> to vector<16x128xi1>
    %146 = arith.select %145, %135, %102 : vector<16x128xi1>, vector<16x128xf32>
    %c3_i32 = arith.constant 3 : i32
    %c16_i32_43 = arith.constant 16 : i32
    %147 = arith.muli %c3_i32, %c16_i32_43 : i32
    %148 = tpu.assume_multiple %147, 16 : i32
    %149 = arith.index_cast %148 : i32 to index
    %c0_44 = arith.constant 0 : index
    %150 = vector.load %arg12[%149, %c0_44] : memref<128x512xf32, #tpu.memory_space<vmem>>, vector<16x512xf32>
    %151 = arith.truncf %143 : vector<16x128xf32> to vector<16x128xbf16>
    %cst_45 = arith.constant dense<0.000000e+00> : vector<16x512xf32>
    %152 = tpu.matmul %151, %11, %cst_45 {dimension_numbers = #tpu.dot_dimension_numbers<[1], [0], [0], [1], [0, 0, 1, 1], [], []>} : vector<16x128xbf16>, vector<128x512xbf16>, vector<16x512xf32> -> vector<16x512xf32>
    %153 = arith.addf %150, %152 : vector<16x512xf32>
    %154 = vector.extract_strided_slice %153 {offsets = [0, 0], sizes = [16, 128], strides = [1, 1]} : vector<16x512xf32> to vector<16x128xf32>
    %cst_46 = arith.constant 0.000000e+00 : f32
    %155 = vector.broadcast %cst_46 : f32 to vector<16x128xf32>
    %156 = arith.subf %155, %154 : vector<16x128xf32>
    %157 = math.exp %156 : vector<16x128xf32>
    %cst_47 = arith.constant 1.000000e+00 : f32
    %158 = vector.broadcast %cst_47 : f32 to vector<16x128xf32>
    %159 = arith.addf %158, %157 : vector<16x128xf32>
    %160 = tpu.reciprocal %159 {approx = true} : vector<16x128xf32> -> vector<16x128xf32>
    %161 = vector.extract_strided_slice %153 {offsets = [0, 128], sizes = [16, 128], strides = [1, 1]} : vector<16x512xf32> to vector<16x128xf32>
    %cst_48 = arith.constant 0.000000e+00 : f32
    %162 = vector.broadcast %cst_48 : f32 to vector<16x128xf32>
    %163 = arith.subf %162, %161 : vector<16x128xf32>
    %164 = math.exp %163 : vector<16x128xf32>
    %cst_49 = arith.constant 1.000000e+00 : f32
    %165 = vector.broadcast %cst_49 : f32 to vector<16x128xf32>
    %166 = arith.addf %165, %164 : vector<16x128xf32>
    %167 = tpu.reciprocal %166 {approx = true} : vector<16x128xf32> -> vector<16x128xf32>
    %168 = vector.extract_strided_slice %153 {offsets = [0, 256], sizes = [16, 128], strides = [1, 1]} : vector<16x512xf32> to vector<16x128xf32>
    %169 = math.tanh %168 : vector<16x128xf32>
    %170 = vector.extract_strided_slice %153 {offsets = [0, 384], sizes = [16, 128], strides = [1, 1]} : vector<16x512xf32> to vector<16x128xf32>
    %cst_50 = arith.constant 0.000000e+00 : f32
    %171 = vector.broadcast %cst_50 : f32 to vector<16x128xf32>
    %172 = arith.subf %171, %170 : vector<16x128xf32>
    %173 = math.exp %172 : vector<16x128xf32>
    %cst_51 = arith.constant 1.000000e+00 : f32
    %174 = vector.broadcast %cst_51 : f32 to vector<16x128xf32>
    %175 = arith.addf %174, %173 : vector<16x128xf32>
    %176 = tpu.reciprocal %175 {approx = true} : vector<16x128xf32> -> vector<16x128xf32>
    %177 = arith.mulf %167, %146 : vector<16x128xf32>
    %178 = arith.mulf %160, %169 : vector<16x128xf32>
    %179 = arith.addf %177, %178 : vector<16x128xf32>
    %180 = math.tanh %179 : vector<16x128xf32>
    %181 = arith.mulf %176, %180 : vector<16x128xf32>
    %182 = arith.addi %12, %c3_i32 : i32
    %183 = vector.broadcast %182 : i32 to vector<16x1xi32>
    %184 = arith.cmpi slt, %183, %10 : vector<16x1xi32>
    %185 = vector.shape_cast %184 : vector<16x1xi1> to vector<16x1xi1>
    %186 = vector.broadcast %185 : vector<16x1xi1> to vector<16x128xi1>
    %187 = arith.select %186, %181, %143 : vector<16x128xi1>, vector<16x128xf32>
    %188 = vector.shape_cast %184 : vector<16x1xi1> to vector<16x1xi1>
    %189 = vector.broadcast %188 : vector<16x1xi1> to vector<16x128xi1>
    %190 = arith.select %189, %179, %146 : vector<16x128xi1>, vector<16x128xf32>
    %c4_i32 = arith.constant 4 : i32
    %c16_i32_52 = arith.constant 16 : i32
    %191 = arith.muli %c4_i32, %c16_i32_52 : i32
    %192 = tpu.assume_multiple %191, 16 : i32
    %193 = arith.index_cast %192 : i32 to index
    %c0_53 = arith.constant 0 : index
    %194 = vector.load %arg12[%193, %c0_53] : memref<128x512xf32, #tpu.memory_space<vmem>>, vector<16x512xf32>
    %195 = arith.truncf %187 : vector<16x128xf32> to vector<16x128xbf16>
    %cst_54 = arith.constant dense<0.000000e+00> : vector<16x512xf32>
    %196 = tpu.matmul %195, %11, %cst_54 {dimension_numbers = #tpu.dot_dimension_numbers<[1], [0], [0], [1], [0, 0, 1, 1], [], []>} : vector<16x128xbf16>, vector<128x512xbf16>, vector<16x512xf32> -> vector<16x512xf32>
    %197 = arith.addf %194, %196 : vector<16x512xf32>
    %198 = vector.extract_strided_slice %197 {offsets = [0, 0], sizes = [16, 128], strides = [1, 1]} : vector<16x512xf32> to vector<16x128xf32>
    %cst_55 = arith.constant 0.000000e+00 : f32
    %199 = vector.broadcast %cst_55 : f32 to vector<16x128xf32>
    %200 = arith.subf %199, %198 : vector<16x128xf32>
    %201 = math.exp %200 : vector<16x128xf32>
    %cst_56 = arith.constant 1.000000e+00 : f32
    %202 = vector.broadcast %cst_56 : f32 to vector<16x128xf32>
    %203 = arith.addf %202, %201 : vector<16x128xf32>
    %204 = tpu.reciprocal %203 {approx = true} : vector<16x128xf32> -> vector<16x128xf32>
    %205 = vector.extract_strided_slice %197 {offsets = [0, 128], sizes = [16, 128], strides = [1, 1]} : vector<16x512xf32> to vector<16x128xf32>
    %cst_57 = arith.constant 0.000000e+00 : f32
    %206 = vector.broadcast %cst_57 : f32 to vector<16x128xf32>
    %207 = arith.subf %206, %205 : vector<16x128xf32>
    %208 = math.exp %207 : vector<16x128xf32>
    %cst_58 = arith.constant 1.000000e+00 : f32
    %209 = vector.broadcast %cst_58 : f32 to vector<16x128xf32>
    %210 = arith.addf %209, %208 : vector<16x128xf32>
    %211 = tpu.reciprocal %210 {approx = true} : vector<16x128xf32> -> vector<16x128xf32>
    %212 = vector.extract_strided_slice %197 {offsets = [0, 256], sizes = [16, 128], strides = [1, 1]} : vector<16x512xf32> to vector<16x128xf32>
    %213 = math.tanh %212 : vector<16x128xf32>
    %214 = vector.extract_strided_slice %197 {offsets = [0, 384], sizes = [16, 128], strides = [1, 1]} : vector<16x512xf32> to vector<16x128xf32>
    %cst_59 = arith.constant 0.000000e+00 : f32
    %215 = vector.broadcast %cst_59 : f32 to vector<16x128xf32>
    %216 = arith.subf %215, %214 : vector<16x128xf32>
    %217 = math.exp %216 : vector<16x128xf32>
    %cst_60 = arith.constant 1.000000e+00 : f32
    %218 = vector.broadcast %cst_60 : f32 to vector<16x128xf32>
    %219 = arith.addf %218, %217 : vector<16x128xf32>
    %220 = tpu.reciprocal %219 {approx = true} : vector<16x128xf32> -> vector<16x128xf32>
    %221 = arith.mulf %211, %190 : vector<16x128xf32>
    %222 = arith.mulf %204, %213 : vector<16x128xf32>
    %223 = arith.addf %221, %222 : vector<16x128xf32>
    %224 = math.tanh %223 : vector<16x128xf32>
    %225 = arith.mulf %220, %224 : vector<16x128xf32>
    %226 = arith.addi %12, %c4_i32 : i32
    %227 = vector.broadcast %226 : i32 to vector<16x1xi32>
    %228 = arith.cmpi slt, %227, %10 : vector<16x1xi32>
    %229 = vector.shape_cast %228 : vector<16x1xi1> to vector<16x1xi1>
    %230 = vector.broadcast %229 : vector<16x1xi1> to vector<16x128xi1>
    %231 = arith.select %230, %225, %187 : vector<16x128xi1>, vector<16x128xf32>
    %232 = vector.shape_cast %228 : vector<16x1xi1> to vector<16x1xi1>
    %233 = vector.broadcast %232 : vector<16x1xi1> to vector<16x128xi1>
    %234 = arith.select %233, %223, %190 : vector<16x128xi1>, vector<16x128xf32>
    %c5_i32 = arith.constant 5 : i32
    %c16_i32_61 = arith.constant 16 : i32
    %235 = arith.muli %c5_i32, %c16_i32_61 : i32
    %236 = tpu.assume_multiple %235, 16 : i32
    %237 = arith.index_cast %236 : i32 to index
    %c0_62 = arith.constant 0 : index
    %238 = vector.load %arg12[%237, %c0_62] : memref<128x512xf32, #tpu.memory_space<vmem>>, vector<16x512xf32>
    %239 = arith.truncf %231 : vector<16x128xf32> to vector<16x128xbf16>
    %cst_63 = arith.constant dense<0.000000e+00> : vector<16x512xf32>
    %240 = tpu.matmul %239, %11, %cst_63 {dimension_numbers = #tpu.dot_dimension_numbers<[1], [0], [0], [1], [0, 0, 1, 1], [], []>} : vector<16x128xbf16>, vector<128x512xbf16>, vector<16x512xf32> -> vector<16x512xf32>
    %241 = arith.addf %238, %240 : vector<16x512xf32>
    %242 = vector.extract_strided_slice %241 {offsets = [0, 0], sizes = [16, 128], strides = [1, 1]} : vector<16x512xf32> to vector<16x128xf32>
    %cst_64 = arith.constant 0.000000e+00 : f32
    %243 = vector.broadcast %cst_64 : f32 to vector<16x128xf32>
    %244 = arith.subf %243, %242 : vector<16x128xf32>
    %245 = math.exp %244 : vector<16x128xf32>
    %cst_65 = arith.constant 1.000000e+00 : f32
    %246 = vector.broadcast %cst_65 : f32 to vector<16x128xf32>
    %247 = arith.addf %246, %245 : vector<16x128xf32>
    %248 = tpu.reciprocal %247 {approx = true} : vector<16x128xf32> -> vector<16x128xf32>
    %249 = vector.extract_strided_slice %241 {offsets = [0, 128], sizes = [16, 128], strides = [1, 1]} : vector<16x512xf32> to vector<16x128xf32>
    %cst_66 = arith.constant 0.000000e+00 : f32
    %250 = vector.broadcast %cst_66 : f32 to vector<16x128xf32>
    %251 = arith.subf %250, %249 : vector<16x128xf32>
    %252 = math.exp %251 : vector<16x128xf32>
    %cst_67 = arith.constant 1.000000e+00 : f32
    %253 = vector.broadcast %cst_67 : f32 to vector<16x128xf32>
    %254 = arith.addf %253, %252 : vector<16x128xf32>
    %255 = tpu.reciprocal %254 {approx = true} : vector<16x128xf32> -> vector<16x128xf32>
    %256 = vector.extract_strided_slice %241 {offsets = [0, 256], sizes = [16, 128], strides = [1, 1]} : vector<16x512xf32> to vector<16x128xf32>
    %257 = math.tanh %256 : vector<16x128xf32>
    %258 = vector.extract_strided_slice %241 {offsets = [0, 384], sizes = [16, 128], strides = [1, 1]} : vector<16x512xf32> to vector<16x128xf32>
    %cst_68 = arith.constant 0.000000e+00 : f32
    %259 = vector.broadcast %cst_68 : f32 to vector<16x128xf32>
    %260 = arith.subf %259, %258 : vector<16x128xf32>
    %261 = math.exp %260 : vector<16x128xf32>
    %cst_69 = arith.constant 1.000000e+00 : f32
    %262 = vector.broadcast %cst_69 : f32 to vector<16x128xf32>
    %263 = arith.addf %262, %261 : vector<16x128xf32>
    %264 = tpu.reciprocal %263 {approx = true} : vector<16x128xf32> -> vector<16x128xf32>
    %265 = arith.mulf %255, %234 : vector<16x128xf32>
    %266 = arith.mulf %248, %257 : vector<16x128xf32>
    %267 = arith.addf %265, %266 : vector<16x128xf32>
    %268 = math.tanh %267 : vector<16x128xf32>
    %269 = arith.mulf %264, %268 : vector<16x128xf32>
    %270 = arith.addi %12, %c5_i32 : i32
    %271 = vector.broadcast %270 : i32 to vector<16x1xi32>
    %272 = arith.cmpi slt, %271, %10 : vector<16x1xi32>
    %273 = vector.shape_cast %272 : vector<16x1xi1> to vector<16x1xi1>
    %274 = vector.broadcast %273 : vector<16x1xi1> to vector<16x128xi1>
    %275 = arith.select %274, %269, %231 : vector<16x128xi1>, vector<16x128xf32>
    %276 = vector.shape_cast %272 : vector<16x1xi1> to vector<16x1xi1>
    %277 = vector.broadcast %276 : vector<16x1xi1> to vector<16x128xi1>
    %278 = arith.select %277, %267, %234 : vector<16x128xi1>, vector<16x128xf32>
    %c6_i32 = arith.constant 6 : i32
    %c16_i32_70 = arith.constant 16 : i32
    %279 = arith.muli %c6_i32, %c16_i32_70 : i32
    %280 = tpu.assume_multiple %279, 16 : i32
    %281 = arith.index_cast %280 : i32 to index
    %c0_71 = arith.constant 0 : index
    %282 = vector.load %arg12[%281, %c0_71] : memref<128x512xf32, #tpu.memory_space<vmem>>, vector<16x512xf32>
    %283 = arith.truncf %275 : vector<16x128xf32> to vector<16x128xbf16>
    %cst_72 = arith.constant dense<0.000000e+00> : vector<16x512xf32>
    %284 = tpu.matmul %283, %11, %cst_72 {dimension_numbers = #tpu.dot_dimension_numbers<[1], [0], [0], [1], [0, 0, 1, 1], [], []>} : vector<16x128xbf16>, vector<128x512xbf16>, vector<16x512xf32> -> vector<16x512xf32>
    %285 = arith.addf %282, %284 : vector<16x512xf32>
    %286 = vector.extract_strided_slice %285 {offsets = [0, 0], sizes = [16, 128], strides = [1, 1]} : vector<16x512xf32> to vector<16x128xf32>
    %cst_73 = arith.constant 0.000000e+00 : f32
    %287 = vector.broadcast %cst_73 : f32 to vector<16x128xf32>
    %288 = arith.subf %287, %286 : vector<16x128xf32>
    %289 = math.exp %288 : vector<16x128xf32>
    %cst_74 = arith.constant 1.000000e+00 : f32
    %290 = vector.broadcast %cst_74 : f32 to vector<16x128xf32>
    %291 = arith.addf %290, %289 : vector<16x128xf32>
    %292 = tpu.reciprocal %291 {approx = true} : vector<16x128xf32> -> vector<16x128xf32>
    %293 = vector.extract_strided_slice %285 {offsets = [0, 128], sizes = [16, 128], strides = [1, 1]} : vector<16x512xf32> to vector<16x128xf32>
    %cst_75 = arith.constant 0.000000e+00 : f32
    %294 = vector.broadcast %cst_75 : f32 to vector<16x128xf32>
    %295 = arith.subf %294, %293 : vector<16x128xf32>
    %296 = math.exp %295 : vector<16x128xf32>
    %cst_76 = arith.constant 1.000000e+00 : f32
    %297 = vector.broadcast %cst_76 : f32 to vector<16x128xf32>
    %298 = arith.addf %297, %296 : vector<16x128xf32>
    %299 = tpu.reciprocal %298 {approx = true} : vector<16x128xf32> -> vector<16x128xf32>
    %300 = vector.extract_strided_slice %285 {offsets = [0, 256], sizes = [16, 128], strides = [1, 1]} : vector<16x512xf32> to vector<16x128xf32>
    %301 = math.tanh %300 : vector<16x128xf32>
    %302 = vector.extract_strided_slice %285 {offsets = [0, 384], sizes = [16, 128], strides = [1, 1]} : vector<16x512xf32> to vector<16x128xf32>
    %cst_77 = arith.constant 0.000000e+00 : f32
    %303 = vector.broadcast %cst_77 : f32 to vector<16x128xf32>
    %304 = arith.subf %303, %302 : vector<16x128xf32>
    %305 = math.exp %304 : vector<16x128xf32>
    %cst_78 = arith.constant 1.000000e+00 : f32
    %306 = vector.broadcast %cst_78 : f32 to vector<16x128xf32>
    %307 = arith.addf %306, %305 : vector<16x128xf32>
    %308 = tpu.reciprocal %307 {approx = true} : vector<16x128xf32> -> vector<16x128xf32>
    %309 = arith.mulf %299, %278 : vector<16x128xf32>
    %310 = arith.mulf %292, %301 : vector<16x128xf32>
    %311 = arith.addf %309, %310 : vector<16x128xf32>
    %312 = math.tanh %311 : vector<16x128xf32>
    %313 = arith.mulf %308, %312 : vector<16x128xf32>
    %314 = arith.addi %12, %c6_i32 : i32
    %315 = vector.broadcast %314 : i32 to vector<16x1xi32>
    %316 = arith.cmpi slt, %315, %10 : vector<16x1xi32>
    %317 = vector.shape_cast %316 : vector<16x1xi1> to vector<16x1xi1>
    %318 = vector.broadcast %317 : vector<16x1xi1> to vector<16x128xi1>
    %319 = arith.select %318, %313, %275 : vector<16x128xi1>, vector<16x128xf32>
    %320 = vector.shape_cast %316 : vector<16x1xi1> to vector<16x1xi1>
    %321 = vector.broadcast %320 : vector<16x1xi1> to vector<16x128xi1>
    %322 = arith.select %321, %311, %278 : vector<16x128xi1>, vector<16x128xf32>
    %c7_i32 = arith.constant 7 : i32
    %c16_i32_79 = arith.constant 16 : i32
    %323 = arith.muli %c7_i32, %c16_i32_79 : i32
    %324 = tpu.assume_multiple %323, 16 : i32
    %325 = arith.index_cast %324 : i32 to index
    %c0_80 = arith.constant 0 : index
    %326 = vector.load %arg12[%325, %c0_80] : memref<128x512xf32, #tpu.memory_space<vmem>>, vector<16x512xf32>
    %327 = arith.truncf %319 : vector<16x128xf32> to vector<16x128xbf16>
    %cst_81 = arith.constant dense<0.000000e+00> : vector<16x512xf32>
    %328 = tpu.matmul %327, %11, %cst_81 {dimension_numbers = #tpu.dot_dimension_numbers<[1], [0], [0], [1], [0, 0, 1, 1], [], []>} : vector<16x128xbf16>, vector<128x512xbf16>, vector<16x512xf32> -> vector<16x512xf32>
    %329 = arith.addf %326, %328 : vector<16x512xf32>
    %330 = vector.extract_strided_slice %329 {offsets = [0, 0], sizes = [16, 128], strides = [1, 1]} : vector<16x512xf32> to vector<16x128xf32>
    %cst_82 = arith.constant 0.000000e+00 : f32
    %331 = vector.broadcast %cst_82 : f32 to vector<16x128xf32>
    %332 = arith.subf %331, %330 : vector<16x128xf32>
    %333 = math.exp %332 : vector<16x128xf32>
    %cst_83 = arith.constant 1.000000e+00 : f32
    %334 = vector.broadcast %cst_83 : f32 to vector<16x128xf32>
    %335 = arith.addf %334, %333 : vector<16x128xf32>
    %336 = tpu.reciprocal %335 {approx = true} : vector<16x128xf32> -> vector<16x128xf32>
    %337 = vector.extract_strided_slice %329 {offsets = [0, 128], sizes = [16, 128], strides = [1, 1]} : vector<16x512xf32> to vector<16x128xf32>
    %cst_84 = arith.constant 0.000000e+00 : f32
    %338 = vector.broadcast %cst_84 : f32 to vector<16x128xf32>
    %339 = arith.subf %338, %337 : vector<16x128xf32>
    %340 = math.exp %339 : vector<16x128xf32>
    %cst_85 = arith.constant 1.000000e+00 : f32
    %341 = vector.broadcast %cst_85 : f32 to vector<16x128xf32>
    %342 = arith.addf %341, %340 : vector<16x128xf32>
    %343 = tpu.reciprocal %342 {approx = true} : vector<16x128xf32> -> vector<16x128xf32>
    %344 = vector.extract_strided_slice %329 {offsets = [0, 256], sizes = [16, 128], strides = [1, 1]} : vector<16x512xf32> to vector<16x128xf32>
    %345 = math.tanh %344 : vector<16x128xf32>
    %346 = vector.extract_strided_slice %329 {offsets = [0, 384], sizes = [16, 128], strides = [1, 1]} : vector<16x512xf32> to vector<16x128xf32>
    %cst_86 = arith.constant 0.000000e+00 : f32
    %347 = vector.broadcast %cst_86 : f32 to vector<16x128xf32>
    %348 = arith.subf %347, %346 : vector<16x128xf32>
    %349 = math.exp %348 : vector<16x128xf32>
    %cst_87 = arith.constant 1.000000e+00 : f32
    %350 = vector.broadcast %cst_87 : f32 to vector<16x128xf32>
    %351 = arith.addf %350, %349 : vector<16x128xf32>
    %352 = tpu.reciprocal %351 {approx = true} : vector<16x128xf32> -> vector<16x128xf32>
    %353 = arith.mulf %343, %322 : vector<16x128xf32>
    %354 = arith.mulf %336, %345 : vector<16x128xf32>
    %355 = arith.addf %353, %354 : vector<16x128xf32>
    %356 = math.tanh %355 : vector<16x128xf32>
    %357 = arith.mulf %352, %356 : vector<16x128xf32>
    %358 = arith.addi %12, %c7_i32 : i32
    %359 = vector.broadcast %358 : i32 to vector<16x1xi32>
    %360 = arith.cmpi slt, %359, %10 : vector<16x1xi32>
    %361 = vector.shape_cast %360 : vector<16x1xi1> to vector<16x1xi1>
    %362 = vector.broadcast %361 : vector<16x1xi1> to vector<16x128xi1>
    %363 = arith.select %362, %357, %319 : vector<16x128xi1>, vector<16x128xf32>
    %364 = vector.shape_cast %360 : vector<16x1xi1> to vector<16x1xi1>
    %365 = vector.broadcast %364 : vector<16x1xi1> to vector<16x128xi1>
    %366 = arith.select %365, %355, %322 : vector<16x128xi1>, vector<16x128xf32>
    %c8_i32_88 = arith.constant 8 : i32
    %c0_89 = arith.constant 0 : index
    %c0_90 = arith.constant 0 : index
    %367 = vector.load %arg10[%c0_89, %c0_90] : memref<16x128xf32, #tpu.memory_space<vmem>>, vector<16x128xf32>
    tpu.vector_store %arg10[%c0_89, %c0_90], %363 {strides = array<i32>} : memref<16x128xf32, #tpu.memory_space<vmem>>, vector<16x128xf32>,
    %c0_91 = arith.constant 0 : index
    %c0_92 = arith.constant 0 : index
    %368 = vector.load %arg11[%c0_91, %c0_92] : memref<16x128xf32, #tpu.memory_space<vmem>>, vector<16x128xf32>
    tpu.vector_store %arg11[%c0_91, %c0_92], %366 {strides = array<i32>} : memref<16x128xf32, #tpu.memory_space<vmem>>, vector<16x128xf32>,
    %c0_i32_93 = arith.constant 0 : i32
    %369 = arith.cmpi eq, %arg1, %c0_i32_93 : i32
    %370 = arith.extui %369 : i1 to i32
    %c0_i32_94 = arith.constant 0 : i32
    %371 = arith.cmpi ne, %370, %c0_i32_94 : i32
    scf.if %371 {
      %372 = arith.truncf %363 : vector<16x128xf32> to vector<16x128xbf16>
      %c0_95 = arith.constant 0 : index
      %c0_96 = arith.constant 0 : index
      %373 = vector.load %arg7[%c0_95, %c0_96] : memref<128x128xbf16, #tpu.memory_space<vmem>>, vector<128x128xbf16>
      %cst_97 = arith.constant dense<0.000000e+00> : vector<16x128xf32>
      %374 = tpu.matmul %372, %373, %cst_97 {dimension_numbers = #tpu.dot_dimension_numbers<[1], [0], [0], [1], [0, 0, 1, 1], [], []>} : vector<16x128xbf16>, vector<128x128xbf16>, vector<16x128xf32> -> vector<16x128xf32>
      %c0_98 = arith.constant 0 : index
      %c0_99 = arith.constant 0 : index
      %375 = vector.load %arg8[%c0_98, %c0_99] : memref<1x128xf32, #tpu.memory_space<vmem>>, vector<1x128xf32>
      %376 = vector.broadcast %375 : vector<1x128xf32> to vector<16x128xf32>
      %377 = arith.addf %374, %376 : vector<16x128xf32>
      %c0_100 = arith.constant 0 : index
      %c0_101 = arith.constant 0 : index
      %378 = vector.load %arg9[%c0_100, %c0_101] : memref<16x128xf32, #tpu.memory_space<vmem>>, vector<16x128xf32>
      tpu.vector_store %arg9[%c0_100, %c0_101], %377 {strides = array<i32>} : memref<16x128xf32, #tpu.memory_space<vmem>>, vector<16x128xf32>,
    } else {
    }
    return
  }
  func.func @transform_0(%arg0: i32, %arg1: i32) -> (i32, i32) {
    %c0_i32 = arith.constant 0 : i32
    %c0_i32_0 = arith.constant 0 : i32
    return %arg0, %c0_i32 : i32, i32
  }
  func.func @transform_1(%arg0: i32, %arg1: i32) -> (i32, i32) {
    %c1_i32 = arith.constant 1 : i32
    %0 = arith.muli %arg0, %c1_i32 : i32
    %1 = arith.addi %0, %arg1 : i32
    %c0_i32 = arith.constant 0 : i32
    %c0_i32_0 = arith.constant 0 : i32
    return %1, %c0_i32 : i32, i32
  }
  func.func @transform_2(%arg0: i32, %arg1: i32) -> (i32, i32) {
    %c0_i32 = arith.constant 0 : i32
    %c0_i32_0 = arith.constant 0 : i32
    %c0_i32_1 = arith.constant 0 : i32
    return %c0_i32, %c0_i32_0 : i32, i32
  }
  func.func @transform_3(%arg0: i32, %arg1: i32) -> (i32, i32) {
    %c0_i32 = arith.constant 0 : i32
    %c0_i32_0 = arith.constant 0 : i32
    %c0_i32_1 = arith.constant 0 : i32
    return %c0_i32, %c0_i32_0 : i32, i32
  }
  func.func @transform_4(%arg0: i32, %arg1: i32) -> (i32, i32) {
    %c0_i32 = arith.constant 0 : i32
    %c0_i32_0 = arith.constant 0 : i32
    %c0_i32_1 = arith.constant 0 : i32
    return %c0_i32, %c0_i32_0 : i32, i32
  }
  func.func @transform_5(%arg0: i32, %arg1: i32) -> (i32, i32) {
    %c0_i32 = arith.constant 0 : i32
    %c0_i32_0 = arith.constant 0 : i32
    %c0_i32_1 = arith.constant 0 : i32
    return %c0_i32, %c0_i32_0 : i32, i32
  }
  func.func @transform_6(%arg0: i32, %arg1: i32) -> (i32, i32) {
    %c0_i32 = arith.constant 0 : i32
    %c0_i32_0 = arith.constant 0 : i32
    %c0_i32_1 = arith.constant 0 : i32
    return %c0_i32, %c0_i32_0 : i32, i32
  }
  func.func @transform_7(%arg0: i32, %arg1: i32) -> (i32, i32) {
    %c0_i32 = arith.constant 0 : i32
    %c0_i32_0 = arith.constant 0 : i32
    return %arg0, %c0_i32 : i32, i32
  }
}

</mosaic_0001>

<bundles_post_ra>
// kernel: tpu_custom_call.1
= control target key start
LH: loop header
LB: loop body
LE: loop exit
PB: predicated region body
PF: predicated region fallthrough
CT: control target
= control target key end

     0   :  { %12 = vsyncpa [#allocation6], 0  ;;  %s3942_s0 = inlined_call_operand.vmem [shape: s32[16,1], index: 0, kind: input, shape index: {}]   ;;  %s3943_s1 = inlined_call_operand.hbm [shape: bf16[128,128], index: 1, kind: input, shape index: {}]   ;;  %s3944_s2 = inlined_call_operand.hbm [shape: bf16[128,512], index: 2, kind: input, shape index: {}]   ;;  %s3945_s3 = inlined_call_operand.hbm [shape: bf16[128,512], index: 3, kind: input, shape index: {}]   ;;  %s3946_s4 = inlined_call_operand.vmem [shape: f32[1,512], index: 4, kind: input, shape index: {}]   ;;  %s3947_s5 = inlined_call_operand.hbm [shape: bf16[128,128], index: 5, kind: input, shape index: {}]   ;;  %s3948_s6 = inlined_call_operand.vmem [shape: f32[1,128], index: 6, kind: input, shape index: {}]   ;;  %s3949_s7 = inlined_call_operand.hbm [shape: f32[16,128], index: 7, kind: output, shape index: {}]  }
   0x1   :  { %13 = vsyncpa [#allocation9], 0 }
   0x2   :  { %14 = vsyncpa [#allocation12], 0 }
   0x3   :  { %15 = vsyncpa [#allocation7], 0  ;;  %s2996_s24 = smov [#allocation8]  }
   0x4   :  { %s39_s25 = sshll.u32 %s2996_s24, 4  ;;  %s40_s25 = int_to_ptr.vmem [resolvable:$true] %s39_s25 }
   0x5   :  { %s2896_s26 = scalar_lea.vmem %s40_s25, 4096  ;;  %p2901_p1 = scmp.lt.s32.totalorder %s40_s25, %s40_s25 }
   0x6   :  { %p2897_p0 = scmp.ne.s32.totalorder %s40_s25, %s2896_s26  ;;  %p2902_p2 = scmp.lt.s32.totalorder %s2896_s26, %s2896_s26 }
   0x8   :  { %p2903_p3 = por %p2902_p2, %p2901_p1 }
   0xa   :  { %p2904_p4 = pnand %p2903_p3, %p2897_p0 }
   0xc   :  { %2907 = shalt.err (!%p2904_p4)
}
   0xd   :  { %s2997_s27 = smov 256   ;;  %s2998_s28 = smov 16  }
   0xe   :  { %45 = dma.hbm_to_vmem [thread:$0]  %s3944_s2, 4096, %s40_s25, [#allocation9], %s2997_s27, %s2997_s27, %s2998_s28  }
   0xf   :  { %s2999_s8 = smov [#allocation5]  }
  0x10   :  { %s27_s9 = sshll.u32 %s2999_s8, 4  ;;  %s28_s9 = int_to_ptr.vmem [resolvable:$true] %s27_s9 }
  0x11   :  { %s2916_s10 = scalar_lea.vmem %s28_s9, 1024  ;;  %p2921_p6 = scmp.lt.s32.totalorder %s28_s9, %s28_s9 }
  0x12   :  { %p2917_p5 = scmp.ne.s32.totalorder %s28_s9, %s2916_s10  ;;  %p2922_p7 = scmp.lt.s32.totalorder %s2916_s10, %s2916_s10 }
  0x14   :  { %p2923_p8 = por %p2922_p7, %p2921_p6 }
  0x16   :  { %p2924_p9 = pnand %p2923_p8, %p2917_p5 }
  0x18   :  { %2927 = shalt.err (!%p2924_p9)
}
  0x19   :  { %s3000_s11 = smov 64   ;;  %s3001_s12 = smov 4  }
  0x1a   :  { %33 = dma.hbm_to_vmem [thread:$0]  %s3943_s1, 1024, %s28_s9, [#allocation6], %s3000_s11, %s3000_s11, %s3001_s12  }
  0x1b   :  { %s3002_s15 = smov [#allocation10]   ;;  %s3003_s17 = smov [#allocation11]  }
  0x1c   :  { %s51_s16 = sshll.u32 %s3002_s15, 4  ;;  %s65_s2 = sshll.u32 %s3003_s17, 4  ;;  %s52_s16 = int_to_ptr.vmem [resolvable:$true] %s51_s16  ;;  %s66_s2 = int_to_ptr.vmem [resolvable:$true] %s65_s2 }
  0x1d   :  { %s2936_s18 = scalar_lea.vmem %s52_s16, 4096  ;;  %p2941_p11 = scmp.lt.s32.totalorder %s52_s16, %s52_s16 }
  0x1e   :  { %p2937_p10 = scmp.ne.s32.totalorder %s52_s16, %s2936_s18  ;;  %p2942_p12 = scmp.lt.s32.totalorder %s2936_s18, %s2936_s18 }
  0x20   :  { %p2943_p13 = por %p2942_p12, %p2941_p11 }
  0x22   :  { %p2944_p0 = pnand %p2943_p13, %p2937_p10 }
  0x24   :  { %2947 = shalt.err (!%p2944_p0)
}
  0x25   :  { %57 = dma.hbm_to_vmem [thread:$0]  %s3945_s3, 4096, %s52_s16, [#allocation9], %s2997_s27, %s2997_s27, %s2998_s28  }
  0x26   :  { %s2956_s1 = scalar_lea.vmem %s66_s2, 1024  ;;  %p2961_p2 = scmp.lt.s32.totalorder %s66_s2, %s66_s2 }
  0x27   :  { %p2957_p1 = scmp.ne.s32.totalorder %s66_s2, %s2956_s1  ;;  %p2962_p3 = scmp.lt.s32.totalorder %s2956_s1, %s2956_s1 }
  0x29   :  { %p2963_p4 = por %p2962_p3, %p2961_p2 }
  0x2b   :  { %p2964_p5 = pnand %p2963_p4, %p2957_p1 }
  0x2d   :  { %2967 = shalt.err (!%p2964_p5)
}
  0x2e   :  { %71 = dma.hbm_to_vmem [thread:$0]  %s3947_s5, 1024, %s66_s2, [#allocation12], %s3000_s11, %s3000_s11, %s3001_s12  }
  0x2f   :  { %2988 = dma.done.wait [#allocation6], 1024  }
  0x30   :  { %2989 = vsyncadd [#allocation6], 4294966272 }
  0x31   :  { %2990 = dma.done.wait [#allocation9], 8192  }
  0x32   :  { %2991 = vsyncadd [#allocation9], 4294959104 }
  0x33   :  { %2992 = dma.done.wait [#allocation12], 1024  }
  0x34   :  { %2993 = vsyncadd [#allocation12], 4294966272  ;;  %v3950_v0 = vmov 0   ;;  %v2488_v1 = vld [vmem:[#allocation8 + $0xe4] ss:$16 sps:$4 sm:$0xff]   ;;  %v2540_v43 = vld [vmem:[#allocation5 + $0x8] sm:$0xff]  }
  0x35   :  { %407 = vmatprep.mubr.bf16.mxu0 %v3950_v0  ;;  %520 = vmatprep.mubr.bf16.mxu1 %v3950_v0  ;;  %v2490_v2 = vld [vmem:[#allocation8 + $0xec] ss:$16 sps:$4 sm:$0xff]   ;;  %v2492_v3 = vld [vmem:[#allocation8 + $0xe0] ss:$16 sps:$4 sm:$0xff]   ;;  %v2493_v4 = vld [vmem:[#allocation8 + $0xe8] ss:$16 sps:$4 sm:$0xff]  }
  0x36   :  { %2486 = vset.pattern.permute.xlu0 %v3950_v0  ;;  %2487 = vset.pattern.permute.xlu1 %v3950_v0  ;;  %v2494_v5 = vld [vmem:[#allocation8 + $0xc4] ss:$16 sps:$4 sm:$0xff]   ;;  %v2496_v6 = vld [vmem:[#allocation8 + $0xcc] ss:$16 sps:$4 sm:$0xff]   ;;  %v2498_v7 = vld [vmem:[#allocation8 + $0xc0] ss:$16 sps:$4 sm:$0xff]  }
  0x37   :  { %375 = vmatprep.subr.bf16.mxu0 %v2488_v1  ;;  %488 = vmatprep.subr.bf16.mxu1 %v2490_v2  ;;  %v2499_v8 = vld [vmem:[#allocation8 + $0xc8] ss:$16 sps:$4 sm:$0xff]   ;;  %v2500_v9 = vld [vmem:[#allocation8 + $0xa4] ss:$16 sps:$4 sm:$0xff]   ;;  %v2502_v10 = vld [vmem:[#allocation8 + $0xac] ss:$16 sps:$4 sm:$0xff]  }
  0x38   :  { %376 = vmatpush1.bf16.msra.mxu0 %v2492_v3  ;;  %489 = vmatpush1.bf16.msra.mxu1 %v2493_v4  ;;  %v2504_v11 = vld [vmem:[#allocation8 + $0xa0] ss:$16 sps:$4 sm:$0xff]   ;;  %v2505_v12 = vld [vmem:[#allocation8 + $0xa8] ss:$16 sps:$4 sm:$0xff]   ;;  %v2506_v13 = vld [vmem:[#allocation8 + $0x84] ss:$16 sps:$4 sm:$0xff]  }
  0x39   :  { %377 = vmatprep.subr.bf16.mxu0 %v2494_v5  ;;  %490 = vmatprep.subr.bf16.mxu1 %v2496_v6  ;;  %v2508_v14 = vld [vmem:[#allocation8 + $0x8c] ss:$16 sps:$4 sm:$0xff]   ;;  %v2510_v15 = vld [vmem:[#allocation8 + $0x80] ss:$16 sps:$4 sm:$0xff]   ;;  %v2511_v16 = vld [vmem:[#allocation8 + $0x88] ss:$16 sps:$4 sm:$0xff]  }
  0x3a   :  { %v2512_v17 = vld [vmem:[#allocation8 + $0x64] ss:$16 sps:$4 sm:$0xff]   ;;  %v2514_v18 = vld [vmem:[#allocation8 + $0x6c] ss:$16 sps:$4 sm:$0xff]   ;;  %v2516_v19 = vld [vmem:[#allocation8 + $0x60] ss:$16 sps:$4 sm:$0xff]  }
  0x3b   :  { %v2517_v20 = vld [vmem:[#allocation8 + $0x68] ss:$16 sps:$4 sm:$0xff]   ;;  %v2518_v21 = vld [vmem:[#allocation8 + $0x44] ss:$16 sps:$4 sm:$0xff]   ;;  %v2520_v22 = vld [vmem:[#allocation8 + $0x4c] ss:$16 sps:$4 sm:$0xff]  }
  0x3c   :  { %378 = vmatpush1.bf16.msra.mxu0 %v2498_v7  ;;  %491 = vmatpush1.bf16.msra.mxu1 %v2499_v8  ;;  %v2522_v23 = vld [vmem:[#allocation8 + $0x40] ss:$16 sps:$4 sm:$0xff]   ;;  %v2523_v24 = vld [vmem:[#allocation8 + $0x48] ss:$16 sps:$4 sm:$0xff]   ;;  %v2524_v25 = vld [vmem:[#allocation8 + $0x24] ss:$16 sps:$4 sm:$0xff]  }
  0x3d   :  { %379 = vmatprep.subr.bf16.mxu0 %v2500_v9  ;;  %492 = vmatprep.subr.bf16.mxu1 %v2502_v10  ;;  %v2526_v26 = vld [vmem:[#allocation8 + $0x2c] ss:$16 sps:$4 sm:$0xff]   ;;  %v2528_v27 = vld [vmem:[#allocation8 + $0x20] ss:$16 sps:$4 sm:$0xff]   ;;  %v2529_v28 = vld [vmem:[#allocation8 + $0x28] ss:$16 sps:$4 sm:$0xff]  }
  0x3e   :  { %v2530_v29 = vld [vmem:[#allocation8 + $0x4] ss:$16 sps:$4 sm:$0xff]   ;;  %v2532_v30 = vld [vmem:[#allocation8 + $0xc] ss:$16 sps:$4 sm:$0xff]   ;;  %v2534_v31 = vld [vmem:[#allocation8] ss:$16 sps:$4 sm:$0xff]  }
  0x3f   :  { %v2535_v32 = vld [vmem:[#allocation8 + $0x8] ss:$16 sps:$4 sm:$0xff]   ;;  %v3073_v33 = vld [vmem:[#allocation10 + $0xe4] ss:$16 sps:$4 sm:$0xff]   ;;  %v3075_v34 = vld [vmem:[#allocation10 + $0xec] ss:$16 sps:$4 sm:$0xff]  }
  0x40   :  { %380 = vmatpush1.bf16.msra.mxu0 %v2504_v11  ;;  %493 = vmatpush1.bf16.msra.mxu1 %v2505_v12  ;;  %v2536_v35 = vld [vmem:[#allocation5] sm:$0xff]   ;;  %v3083_v38 = vld [vmem:[#allocation10 + $0xe8] ss:$16 sps:$4 sm:$0xff]   ;;  %v3085_v39 = vld [vmem:[#allocation10 + $0xcc] ss:$16 sps:$4 sm:$0xff]   ;;  %s3008_s27 = smov [#allocation13]  }
  0x41   :  { %381 = vmatprep.subr.bf16.mxu0 %v2506_v13  ;;  %494 = vmatprep.subr.bf16.mxu1 %v2508_v14  ;;  %v3077_v36 = vld [vmem:[#allocation10 + $0xe0] ss:$16 sps:$4 sm:$0xff]   ;;  %v3080_v37 = vld [vmem:[#allocation10 + $0xc4] ss:$16 sps:$4 sm:$0xff]   ;;  %v3096_v42 = vld [vmem:[#allocation10 + $0xc8] ss:$16 sps:$4 sm:$0xff]  }
  0x42   :  { %v3089_v40 = vld [vmem:[#allocation10 + $0xc0] ss:$16 sps:$4 sm:$0xff]   ;;  %v3093_v41 = vld [vmem:[#allocation10 + $0xa4] ss:$16 sps:$4 sm:$0xff]   ;;  %v3105_v46 = vld [vmem:[#allocation10 + $0xac] ss:$16 sps:$4 sm:$0xff]  }
  0x43   :  { %v3100_v44 = vld [vmem:[#allocation10 + $0xa0] ss:$16 sps:$4 sm:$0xff]   ;;  %v3102_v45 = vld [vmem:[#allocation10 + $0x84] ss:$16 sps:$4 sm:$0xff]   ;;  %v3108_v47 = vld [vmem:[#allocation10 + $0xa8] ss:$16 sps:$4 sm:$0xff]  }
  0x44   :  { %382 = vmatpush1.bf16.msra.mxu0 %v2510_v15  ;;  %495 = vmatpush1.bf16.msra.mxu1 %v2511_v16  ;;  %v3110_v48 = vld [vmem:[#allocation10 + $0x8c] ss:$16 sps:$4 sm:$0xff]   ;;  %v3115_v49 = vld [vmem:[#allocation10 + $0x80] ss:$16 sps:$4 sm:$0xff]   ;;  %v3117_v50 = vld [vmem:[#allocation10 + $0x64] ss:$16 sps:$4 sm:$0xff]  }
  0x45   :  { %383 = vmatprep.subr.bf16.mxu0 %v2512_v17  ;;  %496 = vmatprep.subr.bf16.mxu1 %v2514_v18  ;;  %v3122_v51 = vld [vmem:[#allocation10 + $0x88] ss:$16 sps:$4 sm:$0xff]   ;;  %v2544_v52 = vld [vmem:[#allocation5 + $0x10] sm:$0xff]   ;;  %v3128_v54 = vld [vmem:[#allocation10 + $0x6c] ss:$16 sps:$4 sm:$0xff]   ;;  %s2318_s28 = sshll.u32 %s3008_s27, 4  ;;  %s2319_s28 = int_to_ptr.vmem [resolvable:$true] %s2318_s28 }
  0x46   :  { %v3125_v53 = vld [vmem:[#allocation10 + $0x60] ss:$16 sps:$4 sm:$0xff]   ;;  %v3131_v55 = vld [vmem:[#allocation10 + $0x44] ss:$16 sps:$4 sm:$0xff]   ;;  %v3134_v56 = vld [vmem:[#allocation10 + $0x68] ss:$16 sps:$4 sm:$0xff]   ;;  %p2973_p7 = scmp.lt.s32.totalorder %s2319_s28, %s2319_s28 }
  0x47   :  { %v3139_v57 = vld [vmem:[%s3942_s0] sm:$0xff]  ;;  %v3141_v58 = vld [vmem:[#allocation10 + $0x4c] ss:$16 sps:$4 sm:$0xff]   ;;  %v3160_v63 = vld [vmem:[#allocation10 + $0x48] ss:$16 sps:$4 sm:$0xff]   ;;  %s2968_s29 = scalar_lea.vmem %s2319_s28, 256 }
  0x48   :  { %384 = vmatpush1.bf16.msra.mxu0 %v2516_v19  ;;  %497 = vmatpush1.bf16.msra.mxu1 %v2517_v20  ;;  %vm2411_vm0 = vcmp.gt.s32.totalorder %v3139_v57, 0  ;;  %v3150_v60 = vld [vmem:[%s3942_s0 + $0x8] sm:$0xff]  ;;  %v3153_v61 = vld [vmem:[#allocation10 + $0x40] ss:$16 sps:$4 sm:$0xff]   ;;  %v3157_v62 = vld [vmem:[#allocation10 + $0x24] ss:$16 sps:$4 sm:$0xff]   ;;  %p2969_p6 = scmp.ne.s32.totalorder %s2319_s28, %s2968_s29  ;;  %p2974_p8 = scmp.lt.s32.totalorder %s2968_s29, %s2968_s29 }
  0x49   :  { %385 = vmatprep.subr.bf16.mxu0 %v2518_v21  ;;  %498 = vmatprep.subr.bf16.mxu1 %v2520_v22  ;;  %v1015_v59 = vsel %vm2411_vm0, 1, %v3950_v0  ;;  %v2551_v1 = vld [vmem:[#allocation5 + $0x18] sm:$0xff]   ;;  %v3162_v2 = vld [vmem:[#allocation10 + $0x20] ss:$16 sps:$4 sm:$0xff]   ;;  %vm2412_vm1 = vcmp.gt.s32.totalorder %v3150_v60, 0  ;;  %vm2415_vm2 = vcmp.gt.s32.totalorder %v3139_v57, 2  ;;  %v147_v21 = vlaneseq }
  0x4a   :  { %v3165_v3 = vld [vmem:[#allocation10 + $0x2c] ss:$16 sps:$4 sm:$0xff]   ;;  %1018 = vperm.xlu0 %2486, %v1015_v59   ;;  %v3168_v4 = vld [vmem:[#allocation10 + $0x4] ss:$16 sps:$4 sm:$0xff]   ;;  %v3170_v5 = vld [vmem:[#allocation10 + $0x28] ss:$16 sps:$4 sm:$0xff]   ;;  %p2975_p9 = por %p2974_p8, %p2973_p7 }
  0x4b   :  { %v3173_v6 = vld [vmem:[#allocation10 + $0xc] ss:$16 sps:$4 sm:$0xff]   ;;  %v1016_v7 = vsel %vm2412_vm1, 1, %v3950_v0  ;;  %v3182_v8 = vld [vmem:[#allocation10] ss:$16 sps:$4 sm:$0xff]   ;;  %v1347_v11 = vsel %vm2415_vm2, 1, %v3950_v0 }
  0x4c   :  { %386 = vmatpush1.bf16.msra.mxu0 %v2522_v23  ;;  %499 = vmatpush1.bf16.msra.mxu1 %v2523_v24  ;;  %v3186_v9 = vld [vmem:[#allocation10 + $0x8] ss:$16 sps:$4 sm:$0xff]   ;;  %v2558_v10 = vld [vmem:[#allocation5 + $0x20] sm:$0xff]   ;;  %vm2417_vm3 = vcmp.gt.s32.totalorder %v3139_v57, 3  ;;  %vm2419_vm4 = vcmp.gt.s32.totalorder %v3139_v57, 4  ;;  %vm2421_vm5 = vcmp.gt.s32.totalorder %v3139_v57, 5  ;;  %p2976_p10 = pnand %p2975_p9, %p2969_p6 }
  0x4d   :  { %387 = vmatprep.subr.bf16.mxu0 %v2524_v25  ;;  %500 = vmatprep.subr.bf16.mxu1 %v2526_v26  ;;  %v1513_v12 = vsel %vm2417_vm3, 1, %v3950_v0  ;;  %v2565_v13 = vld [vmem:[#allocation5 + $0x28] sm:$0xff]   ;;  %v1679_v14 = vsel %vm2419_vm4, 1, %v3950_v0  ;;  %v1845_v15 = vsel %vm2421_vm5, 1, %v3950_v0  ;;  %v2572_v16 = vld [vmem:[#allocation5 + $0x30] sm:$0xff]   ;;  %vm2423_vm6 = vcmp.gt.s32.totalorder %v3139_v57, 6 }
  0x4e   :  { %1021 = vperm.xlu0 %2486, %v1016_v7   ;;  %v2011_v17 = vsel %vm2423_vm6, 1, %v3950_v0  ;;  %vm2425_vm7 = vcmp.gt.s32.totalorder %v3139_v57, 7  ;;  %v2582_v19 = vld [vmem:[#allocation5 + $0x38] sm:$0xff]   ;;  %v3005_v20 = vmov 0.0|0.0   ;;  %v148_v22 = vshrl.u32 %v147_v21, 7 }
  0x4f   :  { %v2177_v18 = vsel %vm2425_vm7, 1, %v3950_v0  ;;  %vm2413_vm8 = vcmp.gt.s32.totalorder %v3139_v57, 1  ;;  %vm2414_vm9 = vcmp.gt.s32.totalorder %v3150_v60, 1  ;;  %vm2416_vm10 = vcmp.gt.s32.totalorder %v3150_v60, 2 }
  0x50   :  { %388 = vmatpush1.bf16.msra.mxu0 %v2528_v27  ;;  %501 = vmatpush1.bf16.msra.mxu1 %v2529_v28  ;;  %v149_v27 = vsub.s32 0, %v148_v22  ;;  %v157_v28 = vsub.s32 2, %v148_v22  ;;  %vm2418_vm11 = vcmp.gt.s32.totalorder %v3150_v60, 3  ;;  %vm2420_vm12 = vcmp.gt.s32.totalorder %v3150_v60, 4 }
  0x51   :  { %389 = vmatprep.subr.bf16.mxu0 %v2530_v29  ;;  %502 = vmatprep.subr.bf16.mxu1 %v2532_v30  ;;  %v1181_v29 = vsel %vm2413_vm8, 1, %v3950_v0  ;;  %v145_v30 = vld [vmem:[%s3946_s4] sm:$0xf]  ;;  %vm2422_vm13 = vcmp.gt.s32.totalorder %v3150_v60, 5  ;;  %vm2424_vm14 = vcmp.gt.s32.totalorder %v3150_v60, 6  ;;  %vm2426_vm15 = vcmp.gt.s32.totalorder %v3150_v60, 7 }
  0x52   :  { %1350 = vperm.xlu0 %2486, %v1347_v11   ;;  %1184 = vperm.xlu1 %2487, %v1181_v29   ;;  %v3273_v7 = vrot.slane %v145_v30, %v157_v28  ;;  %v1514_v29 = vsel %vm2418_vm11, 1, %v3950_v0 }
  0x54   :  { %390 = vmatpush1.bf16.msra.mxu0 %v2534_v31  ;;  %503 = vmatpush1.bf16.msra.mxu1 %v2535_v32  ;;  %v153_v31 = vsub.s32 1, %v148_v22 }
  0x55   :  { %876 = vmatprep.subr.bf16.mxu0 %v3073_v33  ;;  %919 = vmatprep.subr.bf16.mxu1 %v3075_v34 }
  0x56   :  { %1516 = vperm.xlu0 %2486, %v1513_v12  }
  0x57   :  { %408 = vmatmul.mubr.bf16.vlgmr.msra.gmra.mxu0 %v2536_v35  ;;  %521 = vmatmul.mubr.bf16.vlgmr.msra.gmra.mxu1 %v2536_v35 }
  0x58   :  { %877 = vmatpush1.bf16.msra.mxu0 %v3077_v36  ;;  %417 = vmatprep.mubr.bf16.mxu0 %v3950_v0 }
  0x59   :  { %530 = vmatprep.mubr.bf16.mxu1 %v3950_v0  ;;  %878 = vmatprep.subr.bf16.mxu0 %v3080_v37 }
  0x5a   :  { %920 = vmatpush1.bf16.msra.mxu1 %v3083_v38  ;;  %1682 = vperm.xlu0 %2486, %v1679_v14  }
  0x5b   :  { %921 = vmatprep.subr.bf16.mxu1 %v3085_v39 }
  0x5c   :  { %879 = vmatpush1.bf16.msra.mxu0 %v3089_v40 }
  0x5d   :  { %880 = vmatprep.subr.bf16.mxu0 %v3093_v41 }
  0x5e   :  { %922 = vmatpush1.bf16.msra.mxu1 %v3096_v42  ;;  %1848 = vperm.xlu0 %2486, %v1845_v15  }
  0x5f   :  { %418 = vmatmul.mubr.bf16.gmra.mxu0 %v2540_v43  ;;  %531 = vmatmul.mubr.bf16.gmra.mxu1 %v2540_v43  ;;  %v161_v43 = vsub.s32 3, %v148_v22 }
  0x60   :  { %427 = vmatprep.mubr.bf16.mxu0 %v3950_v0  ;;  %540 = vmatprep.mubr.bf16.mxu1 %v3950_v0 }
  0x61   :  { %881 = vmatpush1.bf16.msra.mxu0 %v3100_v44  ;;  %923 = vmatprep.subr.bf16.mxu1 %v3105_v46 }
  0x62   :  { %882 = vmatprep.subr.bf16.mxu0 %v3102_v45  ;;  %924 = vmatpush1.bf16.msra.mxu1 %v3108_v47 }
  0x63   :  { %925 = vmatprep.subr.bf16.mxu1 %v3110_v48  ;;  %2014 = vperm.xlu0 %2486, %v2011_v17  }
  0x65   :  { %883 = vmatpush1.bf16.msra.mxu0 %v3115_v49 }
  0x66   :  { %884 = vmatprep.subr.bf16.mxu0 %v3117_v50  ;;  %926 = vmatpush1.bf16.msra.mxu1 %v3122_v51 }
  0x67   :  { %428 = vmatmul.mubr.bf16.gmra.mxu0 %v2544_v52  ;;  %541 = vmatmul.mubr.bf16.gmra.mxu1 %v2544_v52  ;;  %v1182_v52 = vsel %vm2414_vm9, 1, %v3950_v0 }
  0x68   :  { %437 = vmatprep.mubr.bf16.mxu0 %v3950_v0  ;;  %550 = vmatprep.mubr.bf16.mxu1 %v3950_v0 }
  0x69   :  { %885 = vmatpush1.bf16.msra.mxu0 %v3125_v53  ;;  %927 = vmatprep.subr.bf16.mxu1 %v3128_v54 }
  0x6a   :  { %886 = vmatprep.subr.bf16.mxu0 %v3131_v55  ;;  %928 = vmatpush1.bf16.msra.mxu1 %v3134_v56 }
  0x6b   :  { %929 = vmatprep.subr.bf16.mxu1 %v3141_v58  ;;  %2180 = vperm.xlu0 %2486, %v2177_v18  }
  0x6c   :  { %1187 = vperm.xlu1 %2487, %v1182_v52  }
  0x6d   :  { %887 = vmatpush1.bf16.msra.mxu0 %v3153_v61 }
  0x6e   :  { %888 = vmatprep.subr.bf16.mxu0 %v3157_v62  ;;  %930 = vmatpush1.bf16.msra.mxu1 %v3160_v63 }
  0x6f   :  { %438 = vmatmul.mubr.bf16.gmra.mxu0 %v2551_v1  ;;  %551 = vmatmul.mubr.bf16.gmra.mxu1 %v2551_v1  ;;  %v3271_v1 = vrot.slane %v145_v30, %v149_v27 }
  0x70   :  { %447 = vmatprep.mubr.bf16.mxu0 %v3950_v0  ;;  %560 = vmatprep.mubr.bf16.mxu1 %v3950_v0 }
  0x71   :  { %889 = vmatpush1.bf16.msra.mxu0 %v3162_v2  ;;  %931 = vmatprep.subr.bf16.mxu1 %v3165_v3 }
  0x72   :  { %890 = vmatprep.subr.bf16.mxu0 %v3168_v4  ;;  %932 = vmatpush1.bf16.msra.mxu1 %v3170_v5 }
  0x73   :  { %933 = vmatprep.subr.bf16.mxu1 %v3173_v6 }
  0x75   :  { %891 = vmatpush1.bf16.msra.mxu0 %v3182_v8 }
  0x76   :  { %934 = vmatpush1.bf16.msra.mxu1 %v3186_v9  ;;  %1041 = vmatprep.subr.bf16.mxu0 %v3073_v33 }
  0x77   :  { %448 = vmatmul.mubr.bf16.gmra.mxu0 %v2558_v10  ;;  %561 = vmatmul.mubr.bf16.gmra.mxu1 %v2558_v10  ;;  %v3275_v10 = vrot.slane %v145_v30, %v153_v31 }
  0x78   :  { %457 = vmatprep.mubr.bf16.mxu0 %v3950_v0  ;;  %570 = vmatprep.mubr.bf16.mxu1 %v3950_v0 }
  0x79   :  { %1084 = vmatprep.subr.bf16.mxu1 %v3075_v34 }
  0x7f   :  { %458 = vmatmul.mubr.bf16.gmra.mxu0 %v2565_v13  ;;  %571 = vmatmul.mubr.bf16.gmra.mxu1 %v2565_v13  ;;  %v3277_v13 = vrot.slane %v145_v30, %v161_v43 }
  0x80   :  { %467 = vmatprep.mubr.bf16.mxu0 %v3950_v0  ;;  %580 = vmatprep.mubr.bf16.mxu1 %v3950_v0 }
  0x87   :  { %468 = vmatmul.mubr.bf16.gmra.mxu0 %v2572_v16  ;;  %581 = vmatmul.mubr.bf16.gmra.mxu1 %v2572_v16  ;;  %v1348_v16 = vsel %vm2416_vm10, 1, %v3950_v0 }
  0x88   :  { %477 = vmatprep.mubr.bf16.mxu0 %v3950_v0  ;;  %590 = vmatprep.mubr.bf16.mxu1 %v3950_v0 }
  0x89   :  { %1353 = vperm.xlu1 %2487, %v1348_v16  }
  0x8d   :  { %1519 = vperm.xlu1 %2487, %v1514_v29  }
  0x8f   :  { %478 = vmatmul.mubr.bf16.gmra.mxu0 %v2582_v19  ;;  %591 = vmatmul.mubr.bf16.gmra.mxu1 %v2582_v19 }
  0x90   :  { %908 = vmatprep.mubr.bf16.mxu0 %v3950_v0  ;;  %951 = vmatprep.mubr.bf16.mxu1 %v3950_v0 }
  0x97   :  { %909 = vmatmul.mubr.bf16.vlgmr.msra.gmra.mxu0 %v3005_v20  ;;  %952 = vmatmul.mubr.bf16.vlgmr.msra.gmra.mxu1 %v3005_v20 }
  0x98   :  { %1042 = vmatpush1.bf16.msra.mxu0 %v3077_v36  ;;  %1085 = vmatpush1.bf16.msra.mxu1 %v3083_v38 }
  0x99   :  { %1043 = vmatprep.subr.bf16.mxu0 %v3080_v37  ;;  %1086 = vmatprep.subr.bf16.mxu1 %v3085_v39 }
  0x9a   :  { %1073 = vmatprep.mubr.bf16.mxu0 %v3950_v0  ;;  %1116 = vmatprep.mubr.bf16.mxu1 %v3950_v0 }
  0x9c   :  { %1044 = vmatpush1.bf16.msra.mxu0 %v3089_v40  ;;  %1087 = vmatpush1.bf16.msra.mxu1 %v3096_v42 }
  0x9d   :  { %1045 = vmatprep.subr.bf16.mxu0 %v3093_v41  ;;  %1088 = vmatprep.subr.bf16.mxu1 %v3105_v46 }
  0xa0   :  { %1046 = vmatpush1.bf16.msra.mxu0 %v3100_v44  ;;  %1089 = vmatpush1.bf16.msra.mxu1 %v3108_v47 }
  0xa1   :  { %1047 = vmatprep.subr.bf16.mxu0 %v3102_v45  ;;  %1090 = vmatprep.subr.bf16.mxu1 %v3110_v48 }
  0xa4   :  { %1048 = vmatpush1.bf16.msra.mxu0 %v3115_v49  ;;  %1091 = vmatpush1.bf16.msra.mxu1 %v3122_v51 }
  0xa5   :  { %1049 = vmatprep.subr.bf16.mxu0 %v3117_v50  ;;  %1092 = vmatprep.subr.bf16.mxu1 %v3128_v54 }
  0xa8   :  { %1050 = vmatpush1.bf16.msra.mxu0 %v3125_v53  ;;  %1093 = vmatpush1.bf16.msra.mxu1 %v3134_v56 }
  0xa9   :  { %1051 = vmatprep.subr.bf16.mxu0 %v3131_v55  ;;  %1094 = vmatprep.subr.bf16.mxu1 %v3141_v58 }
  0xac   :  { %1052 = vmatpush1.bf16.msra.mxu0 %v3153_v61  ;;  %1095 = vmatpush1.bf16.msra.mxu1 %v3160_v63 }
  0xad   :  { %1053 = vmatprep.subr.bf16.mxu0 %v3157_v62  ;;  %1096 = vmatprep.subr.bf16.mxu1 %v3165_v3 }
  0xb0   :  { %1054 = vmatpush1.bf16.msra.mxu0 %v3162_v2  ;;  %1097 = vmatpush1.bf16.msra.mxu1 %v3170_v5 }
  0xb1   :  { %1055 = vmatprep.subr.bf16.mxu0 %v3168_v4  ;;  %1098 = vmatprep.subr.bf16.mxu1 %v3173_v6 }
  0xb4   :  { %1056 = vmatpush1.bf16.msra.mxu0 %v3182_v8  ;;  %1099 = vmatpush1.bf16.msra.mxu1 %v3186_v9 }
  0xb5   :  { %1207 = vmatprep.subr.bf16.mxu0 %v3073_v33  ;;  %1250 = vmatprep.subr.bf16.mxu1 %v3075_v34 }
 0x117   :  { %v3247_v23 = vpop.f32.mrf.mxu0  ;;  %v3249_v24 = vpop.f32.mrf.mxu1 }
 0x119   :  { %v3251_v25 = vpop.f32.mrf.mxu0  ;;  %v3253_v26 = vpop.f32.mrf.mxu1 }
 0x11b   :  { %v3261_v32 = vpop.f32.mrf.mxu0  ;;  %v3263_v35 = vpop.f32.mrf.mxu1 }
 0x11d   :  { %v3266_v57 = vpop.f32.mrf.mxu0  ;;  %v3268_v59 = vpop.f32.mrf.mxu1 }
 0x11f   :  { %v419_v11 = vpop.f32.mrf.mxu0  ;;  %v532_v12 = vpop.f32.mrf.mxu1 }
 0x120   :  { %v3280_v14 = vadd.f32 %v419_v11, %v3271_v1  ;;  %v3283_v15 = vadd.f32 %v532_v12, %v3273_v7 }
 0x121   :  { %v421_v17 = vpop.f32.mrf.mxu0  ;;  %v534_v18 = vpop.f32.mrf.mxu1 }
 0x122   :  { %3952 = vst [vmem:[#allocation18_spill] sm:$0xff] %v3283_v15  ;;  %v3288_v19 = vadd.f32 %v421_v17, %v3275_v10  ;;  %v3291_v20 = vadd.f32 %v534_v18, %v3277_v13  ;;  %v1680_v18 = vsel %vm2420_vm12, 1, %v3950_v0 }
 0x123   :  { %v423_v21 = vpop.f32.mrf.mxu0  ;;  %v536_v22 = vpop.f32.mrf.mxu1  ;;  %1685 = vperm.xlu1 %2487, %v1680_v18  }
 0x124   :  { %3953 = vst [vmem:[#allocation19_spill] sm:$0xff] %v3291_v20  ;;  %v3294_v27 = vadd.f32 %v423_v21, %v3271_v1  ;;  %v3297_v28 = vadd.f32 %v536_v22, %v3273_v7 }
 0x125   :  { %v425_v30 = vpop.f32.mrf.mxu0  ;;  %v538_v31 = vpop.f32.mrf.mxu1 }
 0x126   :  { %3954 = vst [vmem:[#allocation20_spill] sm:$0xff] %v3297_v28  ;;  %v3302_v43 = vadd.f32 %v425_v30, %v3275_v10  ;;  %v3305_v52 = vadd.f32 %v538_v31, %v3277_v13 }
 0x127   :  { %v429_v11 = vpop.f32.mrf.mxu0  ;;  %v542_v12 = vpop.f32.mrf.mxu1 }
 0x128   :  { %3955 = vst [vmem:[#allocation21_spill] sm:$0xff] %v3302_v43  ;;  %3956 = vst [vmem:[#allocation22_spill] sm:$0xff] %v3305_v52  ;;  %v3308_v16 = vadd.f32 %v429_v11, %v3271_v1  ;;  %v3311_v17 = vadd.f32 %v542_v12, %v3273_v7 }
 0x129   :  { %v431_v21 = vpop.f32.mrf.mxu0  ;;  %v544_v22 = vpop.f32.mrf.mxu1 }
 0x12a   :  { %3957 = vst [vmem:[#allocation23_spill] sm:$0xff] %v3308_v16  ;;  %3958 = vst [vmem:[#allocation24_spill] sm:$0xff] %v3311_v17  ;;  %v3316_v30 = vadd.f32 %v431_v21, %v3275_v10  ;;  %v3319_v31 = vadd.f32 %v544_v22, %v3277_v13  ;;  %v1846_v17 = vsel %vm2422_vm13, 1, %v3950_v0 }
 0x12b   :  { %v433_v28 = vpop.f32.mrf.mxu0  ;;  %v546_v29 = vpop.f32.mrf.mxu1  ;;  %1851 = vperm.xlu1 %2487, %v1846_v17  }
 0x12c   :  { %3959 = vst [vmem:[#allocation25_spill] sm:$0xff] %v3316_v30  ;;  %3960 = vst [vmem:[#allocation26_spill] sm:$0xff] %v3319_v31  ;;  %v3322_v11 = vadd.f32 %v433_v28, %v3271_v1  ;;  %v3325_v12 = vadd.f32 %v546_v29, %v3273_v7 }
 0x12d   :  { %v435_v16 = vpop.f32.mrf.mxu0  ;;  %v548_v15 = vpop.f32.mrf.mxu1 }
 0x12e   :  { %3961 = vst [vmem:[#allocation27_spill] sm:$0xff] %v3322_v11  ;;  %3962 = vst [vmem:[#allocation28_spill] sm:$0xff] %v3325_v12  ;;  %v3330_v21 = vadd.f32 %v435_v16, %v3275_v10  ;;  %v3333_v22 = vadd.f32 %v548_v15, %v3277_v13  ;;  %v2012_v12 = vsel %vm2424_vm14, 1, %v3950_v0 }
 0x12f   :  { %v439_v31 = vpop.f32.mrf.mxu0  ;;  %v552_v18 = vpop.f32.mrf.mxu1  ;;  %2017 = vperm.xlu1 %2487, %v2012_v12  }
 0x130   :  { %3963 = vst [vmem:[#allocation29_spill] sm:$0xff] %v3330_v21  ;;  %3964 = vst [vmem:[#allocation30_spill] sm:$0xff] %v3333_v22  ;;  %v3336_v28 = vadd.f32 %v439_v31, %v3271_v1  ;;  %v3339_v29 = vadd.f32 %v552_v18, %v3273_v7 }
 0x131   :  { %v441_v11 = vpop.f32.mrf.mxu0  ;;  %v554_v30 = vpop.f32.mrf.mxu1 }
 0x132   :  { %3965 = vst [vmem:[#allocation31_spill] sm:$0xff] %v3336_v28  ;;  %3966 = vst [vmem:[#allocation32_spill] sm:$0xff] %v3339_v29  ;;  %v3344_v16 = vadd.f32 %v441_v11, %v3275_v10  ;;  %v3347_v15 = vadd.f32 %v554_v30, %v3277_v13  ;;  %v2178_v29 = vsel %vm2426_vm15, 1, %v3950_v0  ;;  %vm3007_vm15 = vmmov 0  }
 0x133   :  { %v443_v22 = vpop.f32.mrf.mxu0  ;;  %v556_v17 = vpop.f32.mrf.mxu1  ;;  %2183 = vperm.xlu1 %2487, %v2178_v29  }
 0x134   :  { %3967 = vst [vmem:[#allocation33_spill] sm:$0xff] %v3344_v16  ;;  %3968 = vst [vmem:[#allocation34_spill] sm:$0xff] %v3347_v15  ;;  %v3350_v31 = vadd.f32 %v443_v22, %v3271_v1  ;;  %v3353_v18 = vadd.f32 %v556_v17, %v3273_v7 }
 0x135   :  { %v445_v28 = vpop.f32.mrf.mxu0  ;;  %v558_v21 = vpop.f32.mrf.mxu1 }
 0x136   :  { %3969 = vst [vmem:[#allocation35_spill] sm:$0xff] %v3350_v31  ;;  %3970 = vst [vmem:[#allocation36_spill] sm:$0xff] %v3353_v18  ;;  %v3357_v60 = vadd.f32 %v445_v28, %v3275_v10  ;;  %v3360_v11 = vadd.f32 %v558_v21, %v3277_v13 }
 0x137   :  { %v449_v30 = vpop.f32.mrf.mxu0  ;;  %v562_v15 = vpop.f32.mrf.mxu1 }
 0x138   :  { %3971 = vst [vmem:[#allocation37_spill] sm:$0xff] %v3357_v60  ;;  %3972 = vst [vmem:[#allocation38_spill] sm:$0xff] %v3360_v11  ;;  %v3363_v12 = vadd.f32 %v449_v30, %v3271_v1  ;;  %v3366_v22 = vadd.f32 %v562_v15, %v3273_v7 }
 0x139   :  { %v451_v17 = vpop.f32.mrf.mxu0  ;;  %v564_v18 = vpop.f32.mrf.mxu1 }
 0x13a   :  { %3973 = vst [vmem:[#allocation39_spill] sm:$0xff] %v3363_v12  ;;  %3974 = vst [vmem:[#allocation40_spill] sm:$0xff] %v3366_v22  ;;  %v3369_v0 = vadd.f32 %v451_v17, %v3275_v10  ;;  %v3372_v28 = vadd.f32 %v564_v18, %v3277_v13 }
 0x13b   :  { %v453_v60 = vpop.f32.mrf.mxu0  ;;  %v566_v21 = vpop.f32.mrf.mxu1 }
 0x13c   :  { %3975 = vst [vmem:[#allocation41_spill] sm:$0xff] %v3369_v0  ;;  %3976 = vst [vmem:[#allocation42_spill] sm:$0xff] %v3372_v28  ;;  %v3375_v11 = vadd.f32 %v453_v60, %v3271_v1  ;;  %v3378_v29 = vadd.f32 %v566_v21, %v3273_v7 }
 0x13d   :  { %v455_v30 = vpop.f32.mrf.mxu0  ;;  %v568_v12 = vpop.f32.mrf.mxu1 }
 0x13e   :  { %3977 = vst [vmem:[#allocation43_spill] sm:$0xff] %v3375_v11  ;;  %3978 = vst [vmem:[#allocation44_spill] sm:$0xff] %v3378_v29  ;;  %v3381_v15 = vadd.f32 %v455_v30, %v3275_v10  ;;  %v3384_v22 = vadd.f32 %v568_v12, %v3277_v13 }
 0x13f   :  { %v459_v17 = vpop.f32.mrf.mxu0  ;;  %v572_v0 = vpop.f32.mrf.mxu1 }
 0x140   :  { %3979 = vst [vmem:[#allocation45_spill] sm:$0xff] %v3381_v15  ;;  %3980 = vst [vmem:[#allocation46_spill] sm:$0xff] %v3384_v22  ;;  %v3387_v18 = vadd.f32 %v459_v17, %v3271_v1  ;;  %v3390_v28 = vadd.f32 %v572_v0, %v3273_v7 }
 0x141   :  { %v461_v60 = vpop.f32.mrf.mxu0  ;;  %v574_v11 = vpop.f32.mrf.mxu1 }
 0x142   :  { %3981 = vst [vmem:[#allocation47_spill] sm:$0xff] %v3387_v18  ;;  %3982 = vst [vmem:[#allocation48_spill] sm:$0xff] %v3390_v28  ;;  %v3393_v21 = vadd.f32 %v461_v60, %v3275_v10  ;;  %v3396_v29 = vadd.f32 %v574_v11, %v3277_v13 }
 0x143   :  { %v463_v30 = vpop.f32.mrf.mxu0  ;;  %v576_v15 = vpop.f32.mrf.mxu1 }
 0x144   :  { %3983 = vst [vmem:[#allocation49_spill] sm:$0xff] %v3393_v21  ;;  %3984 = vst [vmem:[#allocation50_spill] sm:$0xff] %v3396_v29  ;;  %v3399_v12 = vadd.f32 %v463_v30, %v3271_v1  ;;  %v3402_v22 = vadd.f32 %v576_v15, %v3273_v7 }
 0x145   :  { %v465_v17 = vpop.f32.mrf.mxu0  ;;  %v578_v18 = vpop.f32.mrf.mxu1 }
 0x146   :  { %3985 = vst [vmem:[#allocation51_spill] sm:$0xff] %v3399_v12  ;;  %3986 = vst [vmem:[#allocation52_spill] sm:$0xff] %v3402_v22  ;;  %v3405_v0 = vadd.f32 %v465_v17, %v3275_v10  ;;  %v3408_v28 = vadd.f32 %v578_v18, %v3277_v13 }
 0x147   :  { %v469_v60 = vpop.f32.mrf.mxu0  ;;  %v582_v21 = vpop.f32.mrf.mxu1 }
 0x148   :  { %3987 = vst [vmem:[#allocation53_spill] sm:$0xff] %v3405_v0  ;;  %3988 = vst [vmem:[#allocation54_spill] sm:$0xff] %v3408_v28  ;;  %v3411_v11 = vadd.f32 %v469_v60, %v3271_v1  ;;  %v3414_v29 = vadd.f32 %v582_v21, %v3273_v7 }
 0x149   :  { %v471_v30 = vpop.f32.mrf.mxu0  ;;  %v584_v12 = vpop.f32.mrf.mxu1 }
 0x14a   :  { %3989 = vst [vmem:[#allocation55_spill] sm:$0xff] %v3411_v11  ;;  %3990 = vst [vmem:[#allocation56_spill] sm:$0xff] %v3414_v29  ;;  %v3417_v15 = vadd.f32 %v471_v30, %v3275_v10  ;;  %v3420_v22 = vadd.f32 %v584_v12, %v3277_v13 }
 0x14b   :  { %v473_v17 = vpop.f32.mrf.mxu0  ;;  %v586_v0 = vpop.f32.mrf.mxu1 }
 0x14c   :  { %3991 = vst [vmem:[#allocation57_spill] sm:$0xff] %v3417_v15  ;;  %3992 = vst [vmem:[#allocation58_spill] sm:$0xff] %v3420_v22  ;;  %v3423_v18 = vadd.f32 %v473_v17, %v3271_v1  ;;  %v3426_v28 = vadd.f32 %v586_v0, %v3273_v7 }
 0x14d   :  { %v475_v60 = vpop.f32.mrf.mxu0  ;;  %v588_v11 = vpop.f32.mrf.mxu1 }
 0x14e   :  { %3993 = vst [vmem:[#allocation59_spill] sm:$0xff] %v3423_v18  ;;  %3994 = vst [vmem:[#allocation60_spill] sm:$0xff] %v3426_v28  ;;  %v3429_v21 = vadd.f32 %v475_v60, %v3275_v10  ;;  %v3432_v29 = vadd.f32 %v588_v11, %v3277_v13 }
 0x14f   :  { %v479_v30 = vpop.f32.mrf.mxu0  ;;  %v592_v15 = vpop.f32.mrf.mxu1 }
 0x150   :  { %3995 = vst [vmem:[#allocation61_spill] sm:$0xff] %v3429_v21  ;;  %3996 = vst [vmem:[#allocation62_spill] sm:$0xff] %v3432_v29  ;;  %v3435_v12 = vadd.f32 %v479_v30, %v3271_v1  ;;  %v3438_v22 = vadd.f32 %v592_v15, %v3273_v7  ;;  %v410_v15 = vadd.f32 %v3247_v23, %v3271_v1 }
 0x151   :  { %v481_v17 = vpop.f32.mrf.mxu0  ;;  %v594_v18 = vpop.f32.mrf.mxu1 }
 0x152   :  { %3997 = vst [vmem:[#allocation63_spill] sm:$0xff] %v3435_v12  ;;  %3998 = vst [vmem:[#allocation64_spill] sm:$0xff] %v3438_v22  ;;  %v3441_v0 = vadd.f32 %v481_v17, %v3275_v10  ;;  %v3444_v28 = vadd.f32 %v594_v18, %v3277_v13 }
 0x153   :  { %v483_v60 = vpop.f32.mrf.mxu0  ;;  %v596_v21 = vpop.f32.mrf.mxu1 }
 0x154   :  { %3999 = vst [vmem:[#allocation65_spill] sm:$0xff] %v3441_v0  ;;  %4000 = vst [vmem:[#allocation66_spill] sm:$0xff] %v3444_v28  ;;  %v3447_v11 = vadd.f32 %v483_v60, %v3271_v1  ;;  %v3450_v29 = vadd.f32 %v596_v21, %v3273_v7  ;;  %v412_v60 = vadd.f32 %v3251_v25, %v3275_v10 }
 0x155   :  { %v485_v30 = vpop.f32.mrf.mxu0  ;;  %v598_v12 = vpop.f32.mrf.mxu1  ;;  %v414_v21 = vadd.f32 %v3261_v32, %v3271_v1 }
 0x156   :  { %4001 = vst [vmem:[#allocation67_spill] sm:$0xff] %v3447_v11  ;;  %4002 = vst [vmem:[#allocation68_spill] sm:$0xff] %v3450_v29  ;;  %v3455_v22 = vadd.f32 %v485_v30, %v3275_v10  ;;  %v3458_v17 = vadd.f32 %v598_v12, %v3277_v13  ;;  %v416_v12 = vadd.f32 %v3266_v57, %v3275_v10 }
 0x157   :  { %v910_v18 = vpop.f32.mrf.mxu0  ;;  %v953_v28 = vpop.f32.mrf.mxu1 }
 0x158   :  { %4003 = vst [vmem:[#allocation69_spill] sm:$0xff] %v3455_v22  ;;  %4004 = vst [vmem:[#allocation70_spill] sm:$0xff] %v3458_v17  ;;  %v962_v11 = vadd.f32 %v910_v18, %v410_v15  ;;  %v525_v15 = vadd.f32 %v3253_v26, %v3277_v13  ;;  %v527_v26 = vadd.f32 %v3263_v35, %v3273_v7 }
 0x159   :  { %v912_v0 = vpop.f32.mrf.mxu0  ;;  %v955_v16 = vpop.f32.mrf.mxu1 }
 0x15a   :  { %v970_v29 = vsub.f32 0.0, %v962_v11  ;;  %v963_v31 = vadd.f32 %v912_v0, %v412_v60  ;;  %v965_v1 = vadd.f32 %v955_v16, %v525_v15 }
 0x15b   :  { %v914_v23 = vpop.f32.mrf.mxu0  ;;  %v957_v25 = vpop.f32.mrf.mxu1 }
 0x15c   :  { %v972_v52 = vmul.f32 1.442695, %v970_v29  ;;  %v980_v30 = vsub.f32 0.0, %v963_v31  ;;  %v966_v22 = vadd.f32 %v914_v23, %v414_v21  ;;  %v529_v31 = vadd.f32 %v3268_v59, %v3277_v13 }
 0x15d   :  { %v916_v17 = vpop.f32.mrf.mxu0  ;;  %v959_v29 = vpop.f32.mrf.mxu1  ;;  %v992_v57 = vsub.f32 0.0, %v965_v1 }
 0x15e   :  { %2600 = vpow2.f32 %v972_v52  ;;  %v982_v20 = vmul.f32 1.442695, %v980_v30  ;;  %v971_v43 = vsub.f32 0.0, %v966_v22  ;;  %v967_v18 = vadd.f32 %v916_v17, %v416_v12 }
 0x15f   :  { %v969_v10 = vadd.f32 %v959_v29, %v529_v31  ;;  %v523_v52 = vadd.f32 %v3249_v24, %v3273_v7  ;;  %v968_v17 = vadd.f32 %v957_v25, %v527_v26 }
 0x160   :  { %2602 = vpow2.f32 %v982_v20  ;;  %v974_v32 = vmul.f32 1.442695, %v971_v43  ;;  %v981_v0 = vsub.f32 0.0, %v967_v18  ;;  %v994_v20 = vmul.f32 1.442695, %v992_v57 }
 0x161   :  { %v964_v22 = vadd.f32 %v953_v28, %v523_v52  ;;  %v993_v43 = vsub.f32 0.0, %v969_v10 }
 0x162   :  { %2604 = vpow2.f32 %v974_v32  ;;  %v984_v11 = vmul.f32 1.442695, %v981_v0 }
 0x163   :  { %v996_v59 = vmul.f32 1.442695, %v993_v43  ;;  %v3480_v43 = vpop.permute.xlu0 %1018 }
 0x164   :  { %2606 = vpow2.f32 %v984_v11  ;;  %vm1023_vm0 = vcmp.eq.s32.totalorder %v3480_v43, 1  ;;  %v3565_v43 = vld [vmem:[#allocation10 + $0xe8] ss:$16 sps:$4 sm:$0xff]  }
 0x165   :  { %2608 = vtanh.f32 %v964_v22 }
 0x166   :  { %2610 = vpow2.f32 %v994_v20 }
 0x16b   :  { %v2601_v16 = vpop.eup %2600 }
 0x16c   :  { %v976_v60 = vadd.f32 1.0, %v2601_v16 }
 0x16d   :  { %v2603_v21 = vpop.eup %2602 }
 0x16e   :  { %2612 = vrcp.f32 %v976_v60  ;;  %v986_v13 = vadd.f32 1.0, %v2603_v21 }
 0x16f   :  { %v2605_v23 = vpop.eup %2604  ;;  %2614 = vtanh.f32 %v968_v17 }
 0x170   :  { %2616 = vrcp.f32 %v986_v13  ;;  %v977_v30 = vadd.f32 1.0, %v2605_v23  ;;  %v4005_v23 = vmov 0  }
 0x171   :  { %2618 = vpow2.f32 %v996_v59  ;;  %v2607_v24 = vpop.eup %2606  ;;  %v3486_v59 = vpop.permute.xlu0 %1021 }
 0x172   :  { %2620 = vrcp.f32 %v977_v30  ;;  %v987_v28 = vadd.f32 1.0, %v2607_v24  ;;  %v2609_v35 = vpop.eup %2608  ;;  %vm1024_vm1 = vcmp.eq.s32.totalorder %v3486_v59, 1  ;;  %v3576_v59 = vld [vmem:[#allocation10 + $0xc0] ss:$16 sps:$4 sm:$0xff]  }
 0x173   :  { %v2611_v7 = vpop.eup %2610  ;;  %vm2436_vm2 = vmpackc.low %vm1024_vm1, %vm1023_vm0 }
 0x174   :  { %2622 = vrcp.f32 %v987_v28  ;;  %v998_v32 = vadd.f32 1.0, %v2611_v7  ;;  %v4010_v7 = vld [vmem:[#allocation20_spill] sm:$0xff] }
 0x176   :  { %2624 = vrcp.f32 %v998_v32 }
 0x17b   :  { %v2613_v12 = vpop.eup %2612 }
 0x17c   :  { %v2615_v25 = vpop.eup %2614  ;;  %v1004_v15 = vmul.f32 %v2613_v12, %v2609_v35 }
 0x17d   :  { %v2617_v18 = vpop.eup %2616 }
 0x17e   :  { %v2619_v1 = vpop.eup %2618  ;;  %v1002_v0 = vmul.f32 0.0, %v2617_v18 }
 0x17f   :  { %v2621_v29 = vpop.eup %2620  ;;  %v999_v10 = vadd.f32 1.0, %v2619_v1 }
 0x180   :  { %v3474_v31 = vadd.f32 %v1004_v15, %v1002_v0  ;;  %v1005_v11 = vmul.f32 %v2621_v29, %v2615_v25 }
 0x181   :  { %v2623_v57 = vpop.eup %2622 }
 0x182   :  { %2626 = vtanh.f32 %v3474_v31  ;;  %v1003_v52 = vmul.f32 0.0, %v2623_v57 }
 0x183   :  { %2628 = vrcp.f32 %v999_v10  ;;  %v2625_v26 = vpop.eup %2624 }
 0x184   :  { %v3477_v22 = vadd.f32 %v1005_v11, %v1003_v52 }
 0x186   :  { %2630 = vtanh.f32 %v3477_v22 }
 0x18f   :  { %v2627_v20 = vpop.eup %2626 }
 0x190   :  { %v3482_v16 = vmul.f32 %v2627_v20, %v2625_v26  ;;  %v2629_v17 = vpop.eup %2628 }
 0x193   :  { %v2631_v60 = vpop.eup %2630 }
 0x194   :  { %v3484_v21 = vmul.f32 %v2631_v60, %v2629_v17  ;;  %v1027_v60 = vsel %vm1023_vm0, %v3474_v31, 0.0 }
 0x196   :  { %v2437_v13 = vpack.c.bf16 %v3484_v21, %v3482_v16 }
 0x198   :  { %2438 = vmatmul.mubr.msk.bf16.vlgmr.msra.gmra.mxu0 %vm2436_vm2, %v2437_v13  ;;  %2441 = vmatmul.mubr.msk.bf16.vlgmr.msra.gmra.mxu1 %vm2436_vm2, %v2437_v13 }
 0x199   :  { %1208 = vmatpush1.bf16.msra.mxu0 %v3077_v36  ;;  %1251 = vmatpush1.bf16.msra.mxu1 %v3083_v38 }
 0x19a   :  { %1209 = vmatprep.subr.bf16.mxu0 %v3080_v37  ;;  %1252 = vmatprep.subr.bf16.mxu1 %v3085_v39 }
 0x19b   :  { %1239 = vmatprep.mubr.bf16.mxu0 %v4005_v23  ;;  %1282 = vmatprep.mubr.bf16.mxu1 %v4005_v23 }
 0x19d   :  { %1210 = vmatpush1.bf16.msra.mxu0 %v3089_v40  ;;  %1253 = vmatpush1.bf16.msra.mxu1 %v3096_v42 }
 0x19e   :  { %1211 = vmatprep.subr.bf16.mxu0 %v3093_v41  ;;  %1254 = vmatprep.subr.bf16.mxu1 %v3105_v46 }
 0x1a1   :  { %1212 = vmatpush1.bf16.msra.mxu0 %v3100_v44  ;;  %1255 = vmatpush1.bf16.msra.mxu1 %v3108_v47 }
 0x1a2   :  { %1213 = vmatprep.subr.bf16.mxu0 %v3102_v45  ;;  %1256 = vmatprep.subr.bf16.mxu1 %v3110_v48 }
 0x1a5   :  { %1214 = vmatpush1.bf16.msra.mxu0 %v3115_v49  ;;  %1257 = vmatpush1.bf16.msra.mxu1 %v3122_v51 }
 0x1a6   :  { %1215 = vmatprep.subr.bf16.mxu0 %v3117_v50  ;;  %1258 = vmatprep.subr.bf16.mxu1 %v3128_v54  ;;  %v4007_v54 = vld [vmem:[#allocation19_spill] sm:$0xff] }
 0x1a9   :  { %1216 = vmatpush1.bf16.msra.mxu0 %v3125_v53  ;;  %1259 = vmatpush1.bf16.msra.mxu1 %v3134_v56 }
 0x1aa   :  { %1217 = vmatprep.subr.bf16.mxu0 %v3131_v55  ;;  %1260 = vmatprep.subr.bf16.mxu1 %v3141_v58 }
 0x1ad   :  { %1218 = vmatpush1.bf16.msra.mxu0 %v3153_v61  ;;  %1261 = vmatpush1.bf16.msra.mxu1 %v3160_v63 }
 0x1ae   :  { %1219 = vmatprep.subr.bf16.mxu0 %v3157_v62  ;;  %1262 = vmatprep.subr.bf16.mxu1 %v3165_v3 }
 0x1b1   :  { %1220 = vmatpush1.bf16.msra.mxu0 %v3162_v2  ;;  %1263 = vmatpush1.bf16.msra.mxu1 %v3170_v5 }
 0x1b2   :  { %1221 = vmatprep.subr.bf16.mxu0 %v3168_v4  ;;  %1264 = vmatprep.subr.bf16.mxu1 %v3173_v6 }
 0x1b5   :  { %1222 = vmatpush1.bf16.msra.mxu0 %v3182_v8  ;;  %1265 = vmatpush1.bf16.msra.mxu1 %v3186_v9 }
 0x1b6   :  { %1373 = vmatprep.subr.bf16.mxu0 %v3073_v33  ;;  %1416 = vmatprep.subr.bf16.mxu1 %v3075_v34  ;;  %v4006_v34 = vld [vmem:[#allocation21_spill] sm:$0xff] }
 0x258   :  { %v1075_v36 = vpop.f32.mrf.mxu0  ;;  %v1118_v37 = vpop.f32.mrf.mxu1 }
 0x259   :  { %v1127_v38 = vadd.f32 %v1075_v36, %v3280_v14  ;;  %v4008_v14 = vld [vmem:[#allocation22_spill] sm:$0xff]  ;;  %v1185_v36 = vpop.permute.xlu1 %1184 }
 0x25a   :  { %v1077_v39 = vpop.f32.mrf.mxu0  ;;  %v1120_v42 = vpop.f32.mrf.mxu1  ;;  %vm1189_vm3 = vcmp.eq.s32.totalorder %v1185_v36, 1 }
 0x25b   :  { %v1135_v40 = vsub.f32 0.0, %v1127_v38  ;;  %v1128_v41 = vadd.f32 %v1077_v39, %v3288_v19  ;;  %v1130_v55 = vadd.f32 %v1120_v42, %v4007_v54 }
 0x25c   :  { %v1079_v44 = vpop.f32.mrf.mxu0  ;;  %v1122_v50 = vpop.f32.mrf.mxu1 }
 0x25d   :  { %v1137_v45 = vmul.f32 1.442695, %v1135_v40  ;;  %v1145_v46 = vsub.f32 0.0, %v1128_v41  ;;  %v1131_v47 = vadd.f32 %v1079_v44, %v3294_v27  ;;  %v1157_v62 = vsub.f32 0.0, %v1130_v55  ;;  %v4009_v27 = vld [vmem:[#allocation18_spill] sm:$0xff]  ;;  %v1188_v31 = vpop.permute.xlu1 %1187 }
 0x25e   :  { %v1081_v48 = vpop.f32.mrf.mxu0  ;;  %v1124_v58 = vpop.f32.mrf.mxu1  ;;  %v1129_v30 = vadd.f32 %v1118_v37, %v4009_v27  ;;  %v1133_v12 = vadd.f32 %v1122_v50, %v4010_v7  ;;  %v1028_v44 = vsel %vm1024_vm1, %v3477_v22, 0.0  ;;  %vm1190_vm4 = vcmp.eq.s32.totalorder %v1188_v31, 1  ;;  %v3585_v27 = vld [vmem:[#allocation10 + $0xac] ss:$16 sps:$4 sm:$0xff]   ;;  %v3600_v7 = vld [vmem:[#allocation10 + $0x80] ss:$16 sps:$4 sm:$0xff]  }
 0x25f   :  { %2632 = vpow2.f32 %v1137_v45  ;;  %v1147_v49 = vmul.f32 1.442695, %v1145_v46  ;;  %v1136_v33 = vsub.f32 0.0, %v1131_v47  ;;  %v1132_v51 = vadd.f32 %v1081_v48, %v4006_v34 }
 0x260   :  { %v1134_v19 = vadd.f32 %v1124_v58, %v4008_v14  ;;  %v1159_v24 = vmul.f32 1.442695, %v1157_v62  ;;  %v1025_v22 = vsel %vm1023_vm0, %v3482_v16, 0.0  ;;  %v3562_v62 = vld [vmem:[#allocation10 + $0xe0] ss:$16 sps:$4 sm:$0xff]  }
 0x261   :  { %2634 = vpow2.f32 %v1147_v49  ;;  %v1139_v53 = vmul.f32 1.442695, %v1136_v33  ;;  %v1146_v56 = vsub.f32 0.0, %v1132_v51  ;;  %v3568_v16 = vld [vmem:[#allocation10 + $0xc4] ss:$16 sps:$4 sm:$0xff]  }
 0x262   :  { %v1158_v28 = vsub.f32 0.0, %v1134_v19  ;;  %v3579_v14 = vld [vmem:[#allocation10 + $0xc8] ss:$16 sps:$4 sm:$0xff]   ;;  %v3582_v19 = vld [vmem:[#allocation10 + $0xa4] ss:$16 sps:$4 sm:$0xff]  }
 0x263   :  { %2636 = vpow2.f32 %v1139_v53  ;;  %v1149_v61 = vmul.f32 1.442695, %v1146_v56  ;;  %v1026_v56 = vsel %vm1024_vm1, %v3484_v21, 0.0  ;;  %v3571_v21 = vld [vmem:[#allocation10 + $0xcc] ss:$16 sps:$4 sm:$0xff]  }
 0x264   :  { %v1161_v18 = vmul.f32 1.442695, %v1158_v28  ;;  %v3594_v28 = vld [vmem:[#allocation10 + $0x84] ss:$16 sps:$4 sm:$0xff]  }
 0x265   :  { %2638 = vpow2.f32 %v1149_v61 }
 0x266   :  { %2640 = vtanh.f32 %v1129_v30  ;;  %v3588_v30 = vld [vmem:[#allocation10 + $0xa0] ss:$16 sps:$4 sm:$0xff]  }
 0x267   :  { %2642 = vpow2.f32 %v1159_v24  ;;  %v3591_v24 = vld [vmem:[#allocation10 + $0xa8] ss:$16 sps:$4 sm:$0xff]  }
 0x26c   :  { %v2633_v35 = vpop.eup %2632 }
 0x26d   :  { %v1141_v25 = vadd.f32 1.0, %v2633_v35  ;;  %v3597_v35 = vld [vmem:[#allocation10 + $0x8c] ss:$16 sps:$4 sm:$0xff]  }
 0x26e   :  { %v2635_v15 = vpop.eup %2634 }
 0x26f   :  { %2644 = vrcp.f32 %v1141_v25  ;;  %v1151_v32 = vadd.f32 1.0, %v2635_v15  ;;  %v3606_v25 = vld [vmem:[#allocation10 + $0x64] ss:$16 sps:$4 sm:$0xff]   ;;  %v3609_v15 = vld [vmem:[#allocation10 + $0x6c] ss:$16 sps:$4 sm:$0xff]  }
 0x270   :  { %v2637_v1 = vpop.eup %2636  ;;  %2646 = vtanh.f32 %v1133_v12  ;;  %v3603_v12 = vld [vmem:[#allocation10 + $0x88] ss:$16 sps:$4 sm:$0xff]  }
 0x271   :  { %2648 = vrcp.f32 %v1151_v32  ;;  %v1142_v0 = vadd.f32 1.0, %v2637_v1  ;;  %v3615_v32 = vld [vmem:[#allocation10 + $0x68] ss:$16 sps:$4 sm:$0xff]   ;;  %v3618_v1 = vld [vmem:[#allocation10 + $0x44] ss:$16 sps:$4 sm:$0xff]  }
 0x272   :  { %2650 = vpow2.f32 %v1161_v18  ;;  %v2639_v29 = vpop.eup %2638  ;;  %v3612_v18 = vld [vmem:[#allocation10 + $0x60] ss:$16 sps:$4 sm:$0xff]  }
 0x273   :  { %2652 = vrcp.f32 %v1142_v0  ;;  %v1152_v11 = vadd.f32 1.0, %v2639_v29  ;;  %v2641_v57 = vpop.eup %2640  ;;  %v3621_v0 = vld [vmem:[#allocation10 + $0x4c] ss:$16 sps:$4 sm:$0xff]   ;;  %v3624_v29 = vld [vmem:[#allocation10 + $0x40] ss:$16 sps:$4 sm:$0xff]  }
 0x274   :  { %v2643_v10 = vpop.eup %2642 }
 0x275   :  { %2654 = vrcp.f32 %v1152_v11  ;;  %v1163_v13 = vadd.f32 1.0, %v2643_v10  ;;  %v3628_v11 = vld [vmem:[#allocation10 + $0x24] ss:$16 sps:$4 sm:$0xff]   ;;  %v4011_v10 = vld [vmem:[#allocation23_spill] sm:$0xff] }
 0x277   :  { %2656 = vrcp.f32 %v1163_v13 }
 0x27c   :  { %v2645_v52 = vpop.eup %2644 }
 0x27d   :  { %v2647_v26 = vpop.eup %2646  ;;  %v1169_v20 = vmul.f32 %v2645_v52, %v2641_v57  ;;  %v3638_v57 = vld [vmem:[#allocation10 + $0xe4] ss:$16 sps:$4 sm:$0xff]  }
 0x27e   :  { %v2649_v17 = vpop.eup %2648 }
 0x27f   :  { %v2651_v37 = vpop.eup %2650  ;;  %v1167_v38 = vmul.f32 %v2649_v17, %v1027_v60 }
 0x280   :  { %v2653_v39 = vpop.eup %2652  ;;  %v1164_v45 = vadd.f32 1.0, %v2651_v37 }
 0x281   :  { %v1171_v40 = vadd.f32 %v1169_v20, %v1167_v38  ;;  %v1170_v41 = vmul.f32 %v2653_v39, %v2647_v26  ;;  %v4012_v26 = vld [vmem:[#allocation25_spill] sm:$0xff] }
 0x282   :  { %v2655_v42 = vpop.eup %2654 }
 0x283   :  { %2658 = vtanh.f32 %v1171_v40  ;;  %v3545_v46 = vsel %vm1189_vm3, %v1171_v40, %v1027_v60  ;;  %v1168_v47 = vmul.f32 %v2655_v42, %v1028_v44  ;;  %v4013_v60 = vld [vmem:[#allocation27_spill] sm:$0xff]  ;;  %v4014_v40 = vld [vmem:[#allocation29_spill] sm:$0xff] }
 0x284   :  { %2660 = vrcp.f32 %v1164_v45  ;;  %v2657_v33 = vpop.eup %2656 }
 0x285   :  { %v1172_v48 = vadd.f32 %v1170_v41, %v1168_v47 }
 0x287   :  { %2662 = vtanh.f32 %v1172_v48  ;;  %v3547_v49 = vsel %vm1190_vm4, %v1172_v48, %v1028_v44  ;;  %v4015_v44 = vld [vmem:[#allocation26_spill] sm:$0xff] }
 0x290   :  { %v2659_v50 = vpop.eup %2658 }
 0x291   :  { %v1175_v34 = vmul.f32 %v2659_v50, %v2657_v33  ;;  %v2661_v53 = vpop.eup %2660  ;;  %v4016_v50 = vld [vmem:[#allocation30_spill] sm:$0xff] }
 0x293   :  { %v3553_v51 = vsel %vm1189_vm3, %v1175_v34, %v1025_v22  ;;  %v4017_v22 = vld [vmem:[#allocation24_spill] sm:$0xff] }
 0x294   :  { %v2663_v54 = vpop.eup %2662 }
 0x295   :  { %v1176_v55 = vmul.f32 %v2663_v54, %v2661_v53 }
 0x297   :  { %v3558_v58 = vsel %vm1190_vm4, %v1176_v55, %v1026_v56 }
 0x298   :  { %v1206_v61 = vpack.c.bf16 %v3558_v58, %v3553_v51 }
 0x29a   :  { %1240 = vmatmul.mubr.bf16.vlgmr.msra.gmra.mxu0 %v1206_v61  ;;  %1283 = vmatmul.mubr.bf16.vlgmr.msra.gmra.mxu1 %v1206_v61  ;;  %v4018_v61 = vld [vmem:[#allocation28_spill] sm:$0xff] }
 0x29b   :  { %1374 = vmatpush1.bf16.msra.mxu0 %v3562_v62  ;;  %1417 = vmatpush1.bf16.msra.mxu1 %v3565_v43 }
 0x29c   :  { %1375 = vmatprep.subr.bf16.mxu0 %v3568_v16  ;;  %1418 = vmatprep.subr.bf16.mxu1 %v3571_v21 }
 0x29d   :  { %1405 = vmatprep.mubr.bf16.mxu0 %v4005_v23  ;;  %1448 = vmatprep.mubr.bf16.mxu1 %v4005_v23 }
 0x29f   :  { %1376 = vmatpush1.bf16.msra.mxu0 %v3576_v59  ;;  %1419 = vmatpush1.bf16.msra.mxu1 %v3579_v14 }
 0x2a0   :  { %1377 = vmatprep.subr.bf16.mxu0 %v3582_v19  ;;  %1420 = vmatprep.subr.bf16.mxu1 %v3585_v27 }
 0x2a3   :  { %1378 = vmatpush1.bf16.msra.mxu0 %v3588_v30  ;;  %1421 = vmatpush1.bf16.msra.mxu1 %v3591_v24 }
 0x2a4   :  { %1379 = vmatprep.subr.bf16.mxu0 %v3594_v28  ;;  %1422 = vmatprep.subr.bf16.mxu1 %v3597_v35 }
 0x2a7   :  { %1380 = vmatpush1.bf16.msra.mxu0 %v3600_v7  ;;  %1423 = vmatpush1.bf16.msra.mxu1 %v3603_v12 }
 0x2a8   :  { %1381 = vmatprep.subr.bf16.mxu0 %v3606_v25  ;;  %1424 = vmatprep.subr.bf16.mxu1 %v3609_v15 }
 0x2ab   :  { %1382 = vmatpush1.bf16.msra.mxu0 %v3612_v18  ;;  %1425 = vmatpush1.bf16.msra.mxu1 %v3615_v32 }
 0x2ac   :  { %1383 = vmatprep.subr.bf16.mxu0 %v3618_v1  ;;  %1426 = vmatprep.subr.bf16.mxu1 %v3621_v0 }
 0x2af   :  { %1384 = vmatpush1.bf16.msra.mxu0 %v3624_v29  ;;  %1427 = vmatpush1.bf16.msra.mxu1 %v3160_v63  ;;  %v3641_v63 = vld [vmem:[#allocation10 + $0xec] ss:$16 sps:$4 sm:$0xff]  }
 0x2b0   :  { %1385 = vmatprep.subr.bf16.mxu0 %v3628_v11  ;;  %1428 = vmatprep.subr.bf16.mxu1 %v3165_v3 }
 0x2b3   :  { %1386 = vmatpush1.bf16.msra.mxu0 %v3162_v2  ;;  %1429 = vmatpush1.bf16.msra.mxu1 %v3170_v5 }
 0x2b4   :  { %1387 = vmatprep.subr.bf16.mxu0 %v3168_v4  ;;  %1430 = vmatprep.subr.bf16.mxu1 %v3173_v6 }
 0x2b7   :  { %1388 = vmatpush1.bf16.msra.mxu0 %v3182_v8  ;;  %1431 = vmatpush1.bf16.msra.mxu1 %v3186_v9 }
 0x2b8   :  { %1539 = vmatprep.subr.bf16.mxu0 %v3638_v57  ;;  %1582 = vmatprep.subr.bf16.mxu1 %v3641_v63 }
 0x35a   :  { %v1241_v3 = vpop.f32.mrf.mxu0  ;;  %v1284_v2 = vpop.f32.mrf.mxu1 }
 0x35b   :  { %v1293_v5 = vadd.f32 %v1241_v3, %v4011_v10  ;;  %v1295_v53 = vadd.f32 %v1284_v2, %v4017_v22 }
 0x35c   :  { %v1243_v52 = vpop.f32.mrf.mxu0  ;;  %v1286_v20 = vpop.f32.mrf.mxu1 }
 0x35d   :  { %v1301_v4 = vsub.f32 0.0, %v1293_v5  ;;  %v1294_v6 = vadd.f32 %v1243_v52, %v4012_v26  ;;  %v1296_v45 = vadd.f32 %v1286_v20, %v4015_v44 }
 0x35e   :  { %v1245_v8 = vpop.f32.mrf.mxu0  ;;  %v1288_v39 = vpop.f32.mrf.mxu1 }
 0x35f   :  { %v1303_v17 = vmul.f32 1.442695, %v1301_v4  ;;  %v1311_v9 = vsub.f32 0.0, %v1294_v6  ;;  %v1297_v13 = vadd.f32 %v1245_v8, %v4013_v60  ;;  %v1323_v33 = vsub.f32 0.0, %v1296_v45 }
 0x360   :  { %v1247_v36 = vpop.f32.mrf.mxu0  ;;  %v1290_v47 = vpop.f32.mrf.mxu1  ;;  %v1299_v3 = vadd.f32 %v1288_v39, %v4018_v61 }
 0x361   :  { %2664 = vpow2.f32 %v1303_v17  ;;  %v1313_v37 = vmul.f32 1.442695, %v1311_v9  ;;  %v1302_v38 = vsub.f32 0.0, %v1297_v13  ;;  %v1298_v41 = vadd.f32 %v1247_v36, %v4014_v40 }
 0x362   :  { %v1300_v34 = vadd.f32 %v1290_v47, %v4016_v50  ;;  %v1325_v54 = vmul.f32 1.442695, %v1323_v33  ;;  %v1354_v33 = vpop.permute.xlu1 %1353 }
 0x363   :  { %2666 = vpow2.f32 %v1313_v37  ;;  %v1305_v42 = vmul.f32 1.442695, %v1302_v38  ;;  %v1312_v31 = vsub.f32 0.0, %v1298_v41  ;;  %v1351_v41 = vpop.permute.xlu0 %1350  ;;  %vm1356_vm6 = vcmp.eq.s32.totalorder %v1354_v33, 1  ;;  %v4022_v33 = vld [vmem:[#allocation37_spill] sm:$0xff] }
 0x364   :  { %v1324_v55 = vsub.f32 0.0, %v1300_v34  ;;  %vm1355_vm5 = vcmp.eq.s32.totalorder %v1351_v41, 1  ;;  %v4021_v41 = vld [vmem:[#allocation35_spill] sm:$0xff] }
 0x365   :  { %2668 = vpow2.f32 %v1305_v42  ;;  %v1315_v48 = vmul.f32 1.442695, %v1312_v31 }
 0x366   :  { %v1327_v52 = vmul.f32 1.442695, %v1324_v55 }
 0x367   :  { %2670 = vpow2.f32 %v1315_v48 }
 0x368   :  { %2672 = vtanh.f32 %v1295_v53 }
 0x369   :  { %2674 = vpow2.f32 %v1325_v54 }
 0x36e   :  { %v2665_v56 = vpop.eup %2664 }
 0x36f   :  { %v1307_v10 = vadd.f32 1.0, %v2665_v56 }
 0x370   :  { %v2667_v5 = vpop.eup %2666 }
 0x371   :  { %2676 = vrcp.f32 %v1307_v10  ;;  %v1317_v4 = vadd.f32 1.0, %v2667_v5  ;;  %v3703_v5 = vld [vmem:[#allocation10 + $0x28] ss:$16 sps:$4 sm:$0xff]  }
 0x372   :  { %v2669_v26 = vpop.eup %2668  ;;  %2678 = vtanh.f32 %v1299_v3 }
 0x373   :  { %2680 = vrcp.f32 %v1317_v4  ;;  %v1308_v6 = vadd.f32 1.0, %v2669_v26  ;;  %v3709_v4 = vld [vmem:[#allocation10 + $0xc] ss:$16 sps:$4 sm:$0xff]   ;;  %v3712_v26 = vld [vmem:[#allocation10] ss:$16 sps:$4 sm:$0xff]  }
 0x374   :  { %2682 = vpow2.f32 %v1327_v52  ;;  %v2671_v20 = vpop.eup %2670  ;;  %v3706_v52 = vld [vmem:[#allocation10 + $0x4] ss:$16 sps:$4 sm:$0xff]  }
 0x375   :  { %2684 = vrcp.f32 %v1308_v6  ;;  %v1318_v2 = vadd.f32 1.0, %v2671_v20  ;;  %v2673_v8 = vpop.eup %2672  ;;  %v3715_v6 = vld [vmem:[#allocation10 + $0x8] ss:$16 sps:$4 sm:$0xff]  }
 0x376   :  { %v2675_v17 = vpop.eup %2674 }
 0x377   :  { %2686 = vrcp.f32 %v1318_v2  ;;  %v1329_v37 = vadd.f32 1.0, %v2675_v17 }
 0x379   :  { %2688 = vrcp.f32 %v1329_v37 }
 0x37e   :  { %v2677_v9 = vpop.eup %2676 }
 0x37f   :  { %v2679_v60 = vpop.eup %2678  ;;  %v1335_v13 = vmul.f32 %v2677_v9, %v2673_v8  ;;  %v4019_v8 = vld [vmem:[#allocation31_spill] sm:$0xff] }
 0x380   :  { %v2681_v36 = vpop.eup %2680 }
 0x381   :  { %v2683_v38 = vpop.eup %2682  ;;  %v1333_v39 = vmul.f32 %v2681_v36, %v3545_v46 }
 0x382   :  { %v2685_v40 = vpop.eup %2684  ;;  %v1330_v31 = vadd.f32 1.0, %v2683_v38 }
 0x383   :  { %v1337_v42 = vadd.f32 %v1335_v13, %v1333_v39  ;;  %v1336_v44 = vmul.f32 %v2685_v40, %v2679_v60  ;;  %v4020_v13 = vld [vmem:[#allocation33_spill] sm:$0xff] }
 0x384   :  { %v2687_v45 = vpop.eup %2686 }
 0x385   :  { %2690 = vtanh.f32 %v1337_v42  ;;  %v3655_v47 = vsel %vm1355_vm5, %v1337_v42, %v3545_v46  ;;  %v1334_v48 = vmul.f32 %v2687_v45, %v3547_v49 }
 0x386   :  { %2692 = vrcp.f32 %v1330_v31  ;;  %v2689_v22 = vpop.eup %2688 }
 0x387   :  { %v1338_v50 = vadd.f32 %v1336_v44, %v1334_v48 }
 0x389   :  { %2694 = vtanh.f32 %v1338_v50  ;;  %v3659_v34 = vsel %vm1356_vm6, %v1338_v50, %v3547_v49  ;;  %v3693_v49 = vld [vmem:[#allocation10 + $0x48] ss:$16 sps:$4 sm:$0xff]  }
 0x392   :  { %v2691_v53 = vpop.eup %2690 }
 0x393   :  { %v1341_v54 = vmul.f32 %v2691_v53, %v2689_v22  ;;  %v2693_v55 = vpop.eup %2692  ;;  %v4023_v53 = vld [vmem:[#allocation34_spill] sm:$0xff] }
 0x395   :  { %v3663_v46 = vsel %vm1355_vm5, %v1341_v54, %v3553_v51  ;;  %v3697_v51 = vld [vmem:[#allocation10 + $0x2c] ss:$16 sps:$4 sm:$0xff]  }
 0x396   :  { %v2695_v56 = vpop.eup %2694 }
 0x397   :  { %v1342_v61 = vmul.f32 %v2695_v56, %v2693_v55 }
 0x399   :  { %v3666_v3 = vsel %vm1356_vm6, %v1342_v61, %v3558_v58  ;;  %v3700_v58 = vld [vmem:[#allocation10 + $0x20] ss:$16 sps:$4 sm:$0xff]  }
 0x39a   :  { %v1372_v10 = vpack.c.bf16 %v3666_v3, %v3663_v46 }
 0x39c   :  { %1406 = vmatmul.mubr.bf16.vlgmr.msra.gmra.mxu0 %v1372_v10  ;;  %1449 = vmatmul.mubr.bf16.vlgmr.msra.gmra.mxu1 %v1372_v10 }
 0x39d   :  { %1540 = vmatpush1.bf16.msra.mxu0 %v3562_v62  ;;  %1583 = vmatpush1.bf16.msra.mxu1 %v3565_v43 }
 0x39e   :  { %1541 = vmatprep.subr.bf16.mxu0 %v3568_v16  ;;  %1584 = vmatprep.subr.bf16.mxu1 %v3571_v21 }
 0x39f   :  { %1571 = vmatprep.mubr.bf16.mxu0 %v4005_v23  ;;  %1614 = vmatprep.mubr.bf16.mxu1 %v4005_v23 }
 0x3a1   :  { %1542 = vmatpush1.bf16.msra.mxu0 %v3576_v59  ;;  %1585 = vmatpush1.bf16.msra.mxu1 %v3579_v14 }
 0x3a2   :  { %1543 = vmatprep.subr.bf16.mxu0 %v3582_v19  ;;  %1586 = vmatprep.subr.bf16.mxu1 %v3585_v27 }
 0x3a5   :  { %1544 = vmatpush1.bf16.msra.mxu0 %v3588_v30  ;;  %1587 = vmatpush1.bf16.msra.mxu1 %v3591_v24 }
 0x3a6   :  { %1545 = vmatprep.subr.bf16.mxu0 %v3594_v28  ;;  %1588 = vmatprep.subr.bf16.mxu1 %v3597_v35 }
 0x3a9   :  { %1546 = vmatpush1.bf16.msra.mxu0 %v3600_v7  ;;  %1589 = vmatpush1.bf16.msra.mxu1 %v3603_v12 }
 0x3aa   :  { %1547 = vmatprep.subr.bf16.mxu0 %v3606_v25  ;;  %1590 = vmatprep.subr.bf16.mxu1 %v3609_v15 }
 0x3ad   :  { %1548 = vmatpush1.bf16.msra.mxu0 %v3612_v18  ;;  %1591 = vmatpush1.bf16.msra.mxu1 %v3615_v32 }
 0x3ae   :  { %1549 = vmatprep.subr.bf16.mxu0 %v3618_v1  ;;  %1592 = vmatprep.subr.bf16.mxu1 %v3621_v0 }
 0x3b1   :  { %1550 = vmatpush1.bf16.msra.mxu0 %v3624_v29  ;;  %1593 = vmatpush1.bf16.msra.mxu1 %v3693_v49 }
 0x3b2   :  { %1551 = vmatprep.subr.bf16.mxu0 %v3628_v11  ;;  %1594 = vmatprep.subr.bf16.mxu1 %v3697_v51 }
 0x3b5   :  { %1552 = vmatpush1.bf16.msra.mxu0 %v3700_v58  ;;  %1595 = vmatpush1.bf16.msra.mxu1 %v3703_v5 }
 0x3b6   :  { %1553 = vmatprep.subr.bf16.mxu0 %v3706_v52  ;;  %1596 = vmatprep.subr.bf16.mxu1 %v3709_v4 }
 0x3b9   :  { %1554 = vmatpush1.bf16.msra.mxu0 %v3712_v26  ;;  %1597 = vmatpush1.bf16.msra.mxu1 %v3715_v6 }
 0x3ba   :  { %1705 = vmatprep.subr.bf16.mxu0 %v3638_v57  ;;  %1748 = vmatprep.subr.bf16.mxu1 %v3641_v63 }
 0x45c   :  { %v1407_v20 = vpop.f32.mrf.mxu0  ;;  %v1450_v2 = vpop.f32.mrf.mxu1 }
 0x45d   :  { %v1459_v17 = vadd.f32 %v1407_v20, %v4019_v8  ;;  %v4024_v20 = vld [vmem:[#allocation38_spill] sm:$0xff] }
 0x45e   :  { %v1409_v9 = vpop.f32.mrf.mxu0  ;;  %v1452_v37 = vpop.f32.mrf.mxu1 }
 0x45f   :  { %v1467_v60 = vsub.f32 0.0, %v1459_v17  ;;  %v1460_v36 = vadd.f32 %v1409_v9, %v4020_v13  ;;  %v1462_v54 = vadd.f32 %v1452_v37, %v4023_v53  ;;  %v4025_v17 = vld [vmem:[#allocation32_spill] sm:$0xff] }
 0x460   :  { %v1411_v38 = vpop.f32.mrf.mxu0  ;;  %v1454_v48 = vpop.f32.mrf.mxu1  ;;  %v1461_v9 = vadd.f32 %v1450_v2, %v4025_v17 }
 0x461   :  { %v1469_v39 = vmul.f32 1.442695, %v1467_v60  ;;  %v1477_v40 = vsub.f32 0.0, %v1460_v36  ;;  %v1463_v42 = vadd.f32 %v1411_v38, %v4021_v41  ;;  %v1489_v10 = vsub.f32 0.0, %v1462_v54  ;;  %v4026_v38 = vld [vmem:[#allocation36_spill] sm:$0xff] }
 0x462   :  { %v1413_v44 = vpop.f32.mrf.mxu0  ;;  %v1456_v56 = vpop.f32.mrf.mxu1 }
 0x463   :  { %2696 = vpow2.f32 %v1469_v39  ;;  %v1479_v45 = vmul.f32 1.442695, %v1477_v40  ;;  %v1468_v31 = vsub.f32 0.0, %v1463_v42  ;;  %v1464_v50 = vadd.f32 %v1413_v44, %v4022_v33 }
 0x464   :  { %v1466_v8 = vadd.f32 %v1456_v56, %v4024_v20  ;;  %v1491_v60 = vmul.f32 1.442695, %v1489_v10  ;;  %v1465_v39 = vadd.f32 %v1454_v48, %v4026_v38  ;;  %v1517_v20 = vpop.permute.xlu0 %1516  ;;  %v1520_v38 = vpop.permute.xlu1 %1519 }
 0x465   :  { %2698 = vpow2.f32 %v1479_v45  ;;  %v1471_v22 = vmul.f32 1.442695, %v1468_v31  ;;  %v1478_v55 = vsub.f32 0.0, %v1464_v50  ;;  %vm1521_vm7 = vcmp.eq.s32.totalorder %v1517_v20, 1  ;;  %v4029_v20 = vld [vmem:[#allocation43_spill] sm:$0xff] }
 0x466   :  { %v1490_v13 = vsub.f32 0.0, %v1466_v8  ;;  %vm1522_vm8 = vcmp.eq.s32.totalorder %v1520_v38, 1  ;;  %v4030_v38 = vld [vmem:[#allocation45_spill] sm:$0xff] }
 0x467   :  { %2700 = vpow2.f32 %v1471_v22  ;;  %v1481_v61 = vmul.f32 1.442695, %v1478_v55 }
 0x468   :  { %v1493_v37 = vmul.f32 1.442695, %v1490_v13 }
 0x469   :  { %2702 = vpow2.f32 %v1481_v61 }
 0x46a   :  { %2704 = vtanh.f32 %v1461_v9 }
 0x46b   :  { %2706 = vpow2.f32 %v1491_v60 }
 0x470   :  { %v2697_v36 = vpop.eup %2696 }
 0x471   :  { %v1473_v40 = vadd.f32 1.0, %v2697_v36 }
 0x472   :  { %v2699_v41 = vpop.eup %2698 }
 0x473   :  { %2708 = vrcp.f32 %v1473_v40  ;;  %v1483_v42 = vadd.f32 1.0, %v2699_v41 }
 0x474   :  { %v2701_v44 = vpop.eup %2700  ;;  %2710 = vtanh.f32 %v1465_v39 }
 0x475   :  { %2712 = vrcp.f32 %v1483_v42  ;;  %v1474_v45 = vadd.f32 1.0, %v2701_v44 }
 0x476   :  { %2714 = vpow2.f32 %v1493_v37  ;;  %v2703_v31 = vpop.eup %2702 }
 0x477   :  { %2716 = vrcp.f32 %v1474_v45  ;;  %v1484_v2 = vadd.f32 1.0, %v2703_v31  ;;  %v2705_v33 = vpop.eup %2704 }
 0x478   :  { %v2707_v50 = vpop.eup %2706 }
 0x479   :  { %2718 = vrcp.f32 %v1484_v2  ;;  %v1495_v55 = vadd.f32 1.0, %v2707_v50 }
 0x47b   :  { %2720 = vrcp.f32 %v1495_v55 }
 0x480   :  { %v2709_v22 = vpop.eup %2708 }
 0x481   :  { %v2711_v48 = vpop.eup %2710  ;;  %v1501_v53 = vmul.f32 %v2709_v22, %v2705_v33 }
 0x482   :  { %v2713_v54 = vpop.eup %2712 }
 0x483   :  { %v2715_v56 = vpop.eup %2714  ;;  %v1499_v61 = vmul.f32 %v2713_v54, %v3655_v47 }
 0x484   :  { %v2717_v10 = vpop.eup %2716  ;;  %v1496_v60 = vadd.f32 1.0, %v2715_v56 }
 0x485   :  { %v1503_v8 = vadd.f32 %v1501_v53, %v1499_v61  ;;  %v1502_v17 = vmul.f32 %v2717_v10, %v2711_v48  ;;  %v4028_v53 = vld [vmem:[#allocation41_spill] sm:$0xff] }
 0x486   :  { %v2719_v9 = vpop.eup %2718 }
 0x487   :  { %2722 = vtanh.f32 %v1503_v8  ;;  %v3731_v13 = vsel %vm1521_vm7, %v1503_v8, %v3655_v47  ;;  %v1500_v36 = vmul.f32 %v2719_v9, %v3659_v34 }
 0x488   :  { %2724 = vrcp.f32 %v1496_v60  ;;  %v2721_v41 = vpop.eup %2720 }
 0x489   :  { %v1504_v39 = vadd.f32 %v1502_v17, %v1500_v36 }
 0x48b   :  { %2726 = vtanh.f32 %v1504_v39  ;;  %v3735_v40 = vsel %vm1522_vm8, %v1504_v39, %v3659_v34 }
 0x494   :  { %v2723_v37 = vpop.eup %2722 }
 0x495   :  { %v1507_v42 = vmul.f32 %v2723_v37, %v2721_v41  ;;  %v2725_v44 = vpop.eup %2724  ;;  %v4031_v37 = vld [vmem:[#allocation42_spill] sm:$0xff] }
 0x497   :  { %v3739_v47 = vsel %vm1521_vm7, %v1507_v42, %v3663_v46 }
 0x498   :  { %v2727_v45 = vpop.eup %2726 }
 0x499   :  { %v1508_v31 = vmul.f32 %v2727_v45, %v2725_v44 }
 0x49b   :  { %v3742_v2 = vsel %vm1522_vm8, %v1508_v31, %v3666_v3  ;;  %v4027_v3 = vld [vmem:[#allocation39_spill] sm:$0xff] }
 0x49c   :  { %v1538_v33 = vpack.c.bf16 %v3742_v2, %v3739_v47 }
 0x49e   :  { %1572 = vmatmul.mubr.bf16.vlgmr.msra.gmra.mxu0 %v1538_v33  ;;  %1615 = vmatmul.mubr.bf16.vlgmr.msra.gmra.mxu1 %v1538_v33 }
 0x49f   :  { %1706 = vmatpush1.bf16.msra.mxu0 %v3562_v62  ;;  %1749 = vmatpush1.bf16.msra.mxu1 %v3565_v43 }
 0x4a0   :  { %1707 = vmatprep.subr.bf16.mxu0 %v3568_v16  ;;  %1750 = vmatprep.subr.bf16.mxu1 %v3571_v21 }
 0x4a1   :  { %1737 = vmatprep.mubr.bf16.mxu0 %v4005_v23  ;;  %1780 = vmatprep.mubr.bf16.mxu1 %v4005_v23 }
 0x4a3   :  { %1708 = vmatpush1.bf16.msra.mxu0 %v3576_v59  ;;  %1751 = vmatpush1.bf16.msra.mxu1 %v3579_v14 }
 0x4a4   :  { %1709 = vmatprep.subr.bf16.mxu0 %v3582_v19  ;;  %1752 = vmatprep.subr.bf16.mxu1 %v3585_v27 }
 0x4a7   :  { %1710 = vmatpush1.bf16.msra.mxu0 %v3588_v30  ;;  %1753 = vmatpush1.bf16.msra.mxu1 %v3591_v24 }
 0x4a8   :  { %1711 = vmatprep.subr.bf16.mxu0 %v3594_v28  ;;  %1754 = vmatprep.subr.bf16.mxu1 %v3597_v35 }
 0x4ab   :  { %1712 = vmatpush1.bf16.msra.mxu0 %v3600_v7  ;;  %1755 = vmatpush1.bf16.msra.mxu1 %v3603_v12 }
 0x4ac   :  { %1713 = vmatprep.subr.bf16.mxu0 %v3606_v25  ;;  %1756 = vmatprep.subr.bf16.mxu1 %v3609_v15 }
 0x4af   :  { %1714 = vmatpush1.bf16.msra.mxu0 %v3612_v18  ;;  %1757 = vmatpush1.bf16.msra.mxu1 %v3615_v32 }
 0x4b0   :  { %1715 = vmatprep.subr.bf16.mxu0 %v3618_v1  ;;  %1758 = vmatprep.subr.bf16.mxu1 %v3621_v0 }
 0x4b3   :  { %1716 = vmatpush1.bf16.msra.mxu0 %v3624_v29  ;;  %1759 = vmatpush1.bf16.msra.mxu1 %v3693_v49 }
 0x4b4   :  { %1717 = vmatprep.subr.bf16.mxu0 %v3628_v11  ;;  %1760 = vmatprep.subr.bf16.mxu1 %v3697_v51 }
 0x4b7   :  { %1718 = vmatpush1.bf16.msra.mxu0 %v3700_v58  ;;  %1761 = vmatpush1.bf16.msra.mxu1 %v3703_v5 }
 0x4b8   :  { %1719 = vmatprep.subr.bf16.mxu0 %v3706_v52  ;;  %1762 = vmatprep.subr.bf16.mxu1 %v3709_v4 }
 0x4bb   :  { %1720 = vmatpush1.bf16.msra.mxu0 %v3712_v26  ;;  %1763 = vmatpush1.bf16.msra.mxu1 %v3715_v6 }
 0x4bc   :  { %1871 = vmatprep.subr.bf16.mxu0 %v3638_v57  ;;  %1914 = vmatprep.subr.bf16.mxu1 %v3641_v63 }
 0x55e   :  { %v1573_v34 = vpop.f32.mrf.mxu0  ;;  %v1616_v46 = vpop.f32.mrf.mxu1 }
 0x55f   :  { %v1625_v50 = vadd.f32 %v1573_v34, %v4027_v3  ;;  %v4032_v34 = vld [vmem:[#allocation46_spill] sm:$0xff] }
 0x560   :  { %v1575_v22 = vpop.f32.mrf.mxu0  ;;  %v1618_v55 = vpop.f32.mrf.mxu1 }
 0x561   :  { %v1633_v48 = vsub.f32 0.0, %v1625_v50  ;;  %v1626_v54 = vadd.f32 %v1575_v22, %v4028_v53  ;;  %v1628_v42 = vadd.f32 %v1618_v55, %v4031_v37  ;;  %v4033_v50 = vld [vmem:[#allocation40_spill] sm:$0xff] }
 0x562   :  { %v1577_v56 = vpop.f32.mrf.mxu0  ;;  %v1620_v36 = vpop.f32.mrf.mxu1  ;;  %v1627_v22 = vadd.f32 %v1616_v46, %v4033_v50 }
 0x563   :  { %v1635_v61 = vmul.f32 1.442695, %v1633_v48  ;;  %v1643_v10 = vsub.f32 0.0, %v1626_v54  ;;  %v1629_v8 = vadd.f32 %v1577_v56, %v4029_v20  ;;  %v1655_v33 = vsub.f32 0.0, %v1628_v42  ;;  %v4034_v56 = vld [vmem:[#allocation44_spill] sm:$0xff] }
 0x564   :  { %v1579_v17 = vpop.f32.mrf.mxu0  ;;  %v1622_v45 = vpop.f32.mrf.mxu1 }
 0x565   :  { %2728 = vpow2.f32 %v1635_v61  ;;  %v1645_v9 = vmul.f32 1.442695, %v1643_v10  ;;  %v1634_v60 = vsub.f32 0.0, %v1629_v8  ;;  %v1630_v39 = vadd.f32 %v1579_v17, %v4030_v38 }
 0x566   :  { %v1632_v3 = vadd.f32 %v1622_v45, %v4032_v34  ;;  %v1657_v48 = vmul.f32 1.442695, %v1655_v33  ;;  %v1631_v61 = vadd.f32 %v1620_v36, %v4034_v56  ;;  %v1683_v34 = vpop.permute.xlu0 %1682  ;;  %v1686_v56 = vpop.permute.xlu1 %1685 }
 0x567   :  { %2730 = vpow2.f32 %v1645_v9  ;;  %v1637_v41 = vmul.f32 1.442695, %v1634_v60  ;;  %v1644_v44 = vsub.f32 0.0, %v1630_v39  ;;  %vm1687_vm9 = vcmp.eq.s32.totalorder %v1683_v34, 1  ;;  %v4037_v34 = vld [vmem:[#allocation51_spill] sm:$0xff] }
 0x568   :  { %v1656_v53 = vsub.f32 0.0, %v1632_v3  ;;  %vm1688_vm10 = vcmp.eq.s32.totalorder %v1686_v56, 1 }
 0x569   :  { %2732 = vpow2.f32 %v1637_v41  ;;  %v1647_v31 = vmul.f32 1.442695, %v1644_v44 }
 0x56a   :  { %v1659_v55 = vmul.f32 1.442695, %v1656_v53 }
 0x56b   :  { %2734 = vpow2.f32 %v1647_v31 }
 0x56c   :  { %2736 = vtanh.f32 %v1627_v22 }
 0x56d   :  { %2738 = vpow2.f32 %v1657_v48 }
 0x572   :  { %v2729_v54 = vpop.eup %2728 }
 0x573   :  { %v1639_v10 = vadd.f32 1.0, %v2729_v54 }
 0x574   :  { %v2731_v20 = vpop.eup %2730 }
 0x575   :  { %2740 = vrcp.f32 %v1639_v10  ;;  %v1649_v8 = vadd.f32 1.0, %v2731_v20 }
 0x576   :  { %v2733_v17 = vpop.eup %2732  ;;  %2742 = vtanh.f32 %v1631_v61 }
 0x577   :  { %2744 = vrcp.f32 %v1649_v8  ;;  %v1640_v9 = vadd.f32 1.0, %v2733_v17 }
 0x578   :  { %2746 = vpow2.f32 %v1659_v55  ;;  %v2735_v60 = vpop.eup %2734 }
 0x579   :  { %2748 = vrcp.f32 %v1640_v9  ;;  %v1650_v46 = vadd.f32 1.0, %v2735_v60  ;;  %v2737_v38 = vpop.eup %2736 }
 0x57a   :  { %v2739_v39 = vpop.eup %2738 }
 0x57b   :  { %2750 = vrcp.f32 %v1650_v46  ;;  %v1661_v44 = vadd.f32 1.0, %v2739_v39 }
 0x57d   :  { %2752 = vrcp.f32 %v1661_v44 }
 0x582   :  { %v2741_v41 = vpop.eup %2740 }
 0x583   :  { %v2743_v36 = vpop.eup %2742  ;;  %v1667_v37 = vmul.f32 %v2741_v41, %v2737_v38 }
 0x584   :  { %v2745_v42 = vpop.eup %2744 }
 0x585   :  { %v2747_v45 = vpop.eup %2746  ;;  %v1665_v31 = vmul.f32 %v2745_v42, %v3731_v13 }
 0x586   :  { %v2749_v33 = vpop.eup %2748  ;;  %v1662_v48 = vadd.f32 1.0, %v2747_v45 }
 0x587   :  { %v1669_v3 = vadd.f32 %v1667_v37, %v1665_v31  ;;  %v1668_v50 = vmul.f32 %v2749_v33, %v2743_v36  ;;  %v4036_v37 = vld [vmem:[#allocation49_spill] sm:$0xff] }
 0x588   :  { %v2751_v22 = vpop.eup %2750 }
 0x589   :  { %2754 = vtanh.f32 %v1669_v3  ;;  %v3791_v53 = vsel %vm1687_vm9, %v1669_v3, %v3731_v13  ;;  %v1666_v54 = vmul.f32 %v2751_v22, %v3735_v40 }
 0x58a   :  { %2756 = vrcp.f32 %v1662_v48  ;;  %v2753_v20 = vpop.eup %2752 }
 0x58b   :  { %v1670_v61 = vadd.f32 %v1668_v50, %v1666_v54 }
 0x58d   :  { %2758 = vtanh.f32 %v1670_v61  ;;  %v3795_v10 = vsel %vm1688_vm10, %v1670_v61, %v3735_v40  ;;  %v4039_v61 = vld [vmem:[#allocation50_spill] sm:$0xff] }
 0x596   :  { %v2755_v55 = vpop.eup %2754 }
 0x597   :  { %v1673_v8 = vmul.f32 %v2755_v55, %v2753_v20  ;;  %v2757_v17 = vpop.eup %2756 }
 0x599   :  { %v3799_v13 = vsel %vm1687_vm9, %v1673_v8, %v3739_v47 }
 0x59a   :  { %v2759_v9 = vpop.eup %2758 }
 0x59b   :  { %v1674_v60 = vmul.f32 %v2759_v9, %v2757_v17 }
 0x59d   :  { %v3802_v46 = vsel %vm1688_vm10, %v1674_v60, %v3742_v2  ;;  %v4035_v2 = vld [vmem:[#allocation47_spill] sm:$0xff]  ;;  %v4040_v60 = vld [vmem:[#allocation54_spill] sm:$0xff] }
 0x59e   :  { %v1704_v38 = vpack.c.bf16 %v3802_v46, %v3799_v13 }
 0x5a0   :  { %1738 = vmatmul.mubr.bf16.vlgmr.msra.gmra.mxu0 %v1704_v38  ;;  %1781 = vmatmul.mubr.bf16.vlgmr.msra.gmra.mxu1 %v1704_v38 }
 0x5a1   :  { %1872 = vmatpush1.bf16.msra.mxu0 %v3562_v62  ;;  %1915 = vmatpush1.bf16.msra.mxu1 %v3565_v43 }
 0x5a2   :  { %1873 = vmatprep.subr.bf16.mxu0 %v3568_v16  ;;  %1916 = vmatprep.subr.bf16.mxu1 %v3571_v21 }
 0x5a3   :  { %1903 = vmatprep.mubr.bf16.mxu0 %v4005_v23  ;;  %1946 = vmatprep.mubr.bf16.mxu1 %v4005_v23 }
 0x5a5   :  { %1874 = vmatpush1.bf16.msra.mxu0 %v3576_v59  ;;  %1917 = vmatpush1.bf16.msra.mxu1 %v3579_v14 }
 0x5a6   :  { %1875 = vmatprep.subr.bf16.mxu0 %v3582_v19  ;;  %1918 = vmatprep.subr.bf16.mxu1 %v3585_v27 }
 0x5a9   :  { %1876 = vmatpush1.bf16.msra.mxu0 %v3588_v30  ;;  %1919 = vmatpush1.bf16.msra.mxu1 %v3591_v24 }
 0x5aa   :  { %1877 = vmatprep.subr.bf16.mxu0 %v3594_v28  ;;  %1920 = vmatprep.subr.bf16.mxu1 %v3597_v35 }
 0x5ad   :  { %1878 = vmatpush1.bf16.msra.mxu0 %v3600_v7  ;;  %1921 = vmatpush1.bf16.msra.mxu1 %v3603_v12 }
 0x5ae   :  { %1879 = vmatprep.subr.bf16.mxu0 %v3606_v25  ;;  %1922 = vmatprep.subr.bf16.mxu1 %v3609_v15 }
 0x5b1   :  { %1880 = vmatpush1.bf16.msra.mxu0 %v3612_v18  ;;  %1923 = vmatpush1.bf16.msra.mxu1 %v3615_v32 }
 0x5b2   :  { %1881 = vmatprep.subr.bf16.mxu0 %v3618_v1  ;;  %1924 = vmatprep.subr.bf16.mxu1 %v3621_v0 }
 0x5b5   :  { %1882 = vmatpush1.bf16.msra.mxu0 %v3624_v29  ;;  %1925 = vmatpush1.bf16.msra.mxu1 %v3693_v49 }
 0x5b6   :  { %1883 = vmatprep.subr.bf16.mxu0 %v3628_v11  ;;  %1926 = vmatprep.subr.bf16.mxu1 %v3697_v51 }
 0x5b9   :  { %1884 = vmatpush1.bf16.msra.mxu0 %v3700_v58  ;;  %1927 = vmatpush1.bf16.msra.mxu1 %v3703_v5 }
 0x5ba   :  { %1885 = vmatprep.subr.bf16.mxu0 %v3706_v52  ;;  %1928 = vmatprep.subr.bf16.mxu1 %v3709_v4 }
 0x5bd   :  { %1886 = vmatpush1.bf16.msra.mxu0 %v3712_v26  ;;  %1929 = vmatpush1.bf16.msra.mxu1 %v3715_v6 }
 0x5be   :  { %2037 = vmatprep.subr.bf16.mxu0 %v3638_v57  ;;  %2080 = vmatprep.subr.bf16.mxu1 %v3641_v63  ;;  %v4038_v63 = vld [vmem:[#allocation53_spill] sm:$0xff] }
 0x660   :  { %v1739_v40 = vpop.f32.mrf.mxu0  ;;  %v1782_v47 = vpop.f32.mrf.mxu1 }
 0x661   :  { %v1791_v39 = vadd.f32 %v1739_v40, %v4035_v2  ;;  %v4041_v40 = vld [vmem:[#allocation48_spill] sm:$0xff] }
 0x662   :  { %v1741_v41 = vpop.f32.mrf.mxu0  ;;  %v1784_v44 = vpop.f32.mrf.mxu1  ;;  %v1793_v2 = vadd.f32 %v1782_v47, %v4041_v40 }
 0x663   :  { %v1799_v36 = vsub.f32 0.0, %v1791_v39  ;;  %v1792_v42 = vadd.f32 %v1741_v41, %v4036_v37  ;;  %v1794_v20 = vadd.f32 %v1784_v44, %v4039_v61  ;;  %v4042_v37 = vld [vmem:[#allocation52_spill] sm:$0xff] }
 0x664   :  { %v1743_v45 = vpop.f32.mrf.mxu0  ;;  %v1786_v48 = vpop.f32.mrf.mxu1 }
 0x665   :  { %v1801_v31 = vmul.f32 1.442695, %v1799_v36  ;;  %v1809_v33 = vsub.f32 0.0, %v1792_v42  ;;  %v1795_v3 = vadd.f32 %v1743_v45, %v4037_v34  ;;  %v1821_v9 = vsub.f32 0.0, %v1794_v20 }
 0x666   :  { %v1745_v50 = vpop.f32.mrf.mxu0  ;;  %v1788_v8 = vpop.f32.mrf.mxu1  ;;  %v1797_v42 = vadd.f32 %v1786_v48, %v4042_v37 }
 0x667   :  { %2760 = vpow2.f32 %v1801_v31  ;;  %v1811_v22 = vmul.f32 1.442695, %v1809_v33  ;;  %v1800_v57 = vsub.f32 0.0, %v1795_v3  ;;  %v1796_v54 = vadd.f32 %v1745_v50, %v4038_v63 }
 0x668   :  { %v1798_v38 = vadd.f32 %v1788_v8, %v4040_v60  ;;  %v1823_v39 = vmul.f32 1.442695, %v1821_v9 }
 0x669   :  { %2762 = vpow2.f32 %v1811_v22  ;;  %v1803_v56 = vmul.f32 1.442695, %v1800_v57  ;;  %v1810_v55 = vsub.f32 0.0, %v1796_v54 }
 0x66a   :  { %v1822_v41 = vsub.f32 0.0, %v1798_v38 }
 0x66b   :  { %2764 = vpow2.f32 %v1803_v56  ;;  %v1813_v17 = vmul.f32 1.442695, %v1810_v55 }
 0x66c   :  { %v1825_v44 = vmul.f32 1.442695, %v1822_v41  ;;  %v1852_v41 = vpop.permute.xlu1 %1851 }
 0x66d   :  { %2766 = vpow2.f32 %v1813_v17  ;;  %v1849_v17 = vpop.permute.xlu0 %1848  ;;  %vm1854_vm12 = vcmp.eq.s32.totalorder %v1852_v41, 1 }
 0x66e   :  { %2768 = vtanh.f32 %v1793_v2  ;;  %vm1853_vm11 = vcmp.eq.s32.totalorder %v1849_v17, 1 }
 0x66f   :  { %2770 = vpow2.f32 %v1823_v39 }
 0x674   :  { %v2761_v36 = vpop.eup %2760 }
 0x675   :  { %v1805_v45 = vadd.f32 1.0, %v2761_v36 }
 0x676   :  { %v2763_v31 = vpop.eup %2762 }
 0x677   :  { %2772 = vrcp.f32 %v1805_v45  ;;  %v1815_v33 = vadd.f32 1.0, %v2763_v31 }
 0x678   :  { %v2765_v34 = vpop.eup %2764  ;;  %2774 = vtanh.f32 %v1797_v42 }
 0x679   :  { %2776 = vrcp.f32 %v1815_v33  ;;  %v1806_v3 = vadd.f32 1.0, %v2765_v34 }
 0x67a   :  { %2778 = vpow2.f32 %v1825_v44  ;;  %v2767_v50 = vpop.eup %2766 }
 0x67b   :  { %2780 = vrcp.f32 %v1806_v3  ;;  %v1816_v47 = vadd.f32 1.0, %v2767_v50  ;;  %v2769_v22 = vpop.eup %2768 }
 0x67c   :  { %v2771_v57 = vpop.eup %2770 }
 0x67d   :  { %2782 = vrcp.f32 %v1816_v47  ;;  %v1827_v61 = vadd.f32 1.0, %v2771_v57  ;;  %v4050_v47 = vld [vmem:[#allocation60_spill] sm:$0xff] }
 0x67f   :  { %2784 = vrcp.f32 %v1827_v61 }
 0x684   :  { %v2773_v63 = vpop.eup %2772 }
 0x685   :  { %v2775_v48 = vpop.eup %2774  ;;  %v1833_v54 = vmul.f32 %v2773_v63, %v2769_v22 }
 0x686   :  { %v2777_v56 = vpop.eup %2776 }
 0x687   :  { %v2779_v20 = vpop.eup %2778  ;;  %v1831_v55 = vmul.f32 %v2777_v56, %v3791_v53 }
 0x688   :  { %v2781_v8 = vpop.eup %2780  ;;  %v1828_v40 = vadd.f32 1.0, %v2779_v20 }
 0x689   :  { %v1835_v9 = vadd.f32 %v1833_v54, %v1831_v55  ;;  %v1834_v60 = vmul.f32 %v2781_v8, %v2775_v48 }
 0x68a   :  { %v2783_v38 = vpop.eup %2782 }
 0x68b   :  { %2786 = vtanh.f32 %v1835_v9  ;;  %v3851_v2 = vsel %vm1853_vm11, %v1835_v9, %v3791_v53  ;;  %v1832_v39 = vmul.f32 %v2783_v38, %v3795_v10 }
 0x68c   :  { %2788 = vrcp.f32 %v1828_v40  ;;  %v2785_v42 = vpop.eup %2784 }
 0x68d   :  { %v1836_v36 = vadd.f32 %v1834_v60, %v1832_v39 }
 0x68f   :  { %2790 = vtanh.f32 %v1836_v36  ;;  %v3855_v37 = vsel %vm1854_vm12, %v1836_v36, %v3795_v10 }
 0x698   :  { %v2787_v45 = vpop.eup %2786 }
 0x699   :  { %v1839_v31 = vmul.f32 %v2787_v45, %v2785_v42  ;;  %v2789_v44 = vpop.eup %2788  ;;  %v2015_v45 = vpop.permute.xlu0 %2014 }
 0x69a   :  { %vm2019_vm13 = vcmp.eq.s32.totalorder %v2015_v45, 1 }
 0x69b   :  { %v3859_v53 = vsel %vm1853_vm11, %v1839_v31, %v3799_v13 }
 0x69c   :  { %v2791_v33 = vpop.eup %2790 }
 0x69d   :  { %v1840_v34 = vmul.f32 %v2791_v33, %v2789_v44 }
 0x69f   :  { %v3862_v3 = vsel %vm1854_vm12, %v1840_v34, %v3802_v46 }
 0x6a0   :  { %v1870_v50 = vpack.c.bf16 %v3862_v3, %v3859_v53 }
 0x6a2   :  { %1904 = vmatmul.mubr.bf16.vlgmr.msra.gmra.mxu0 %v1870_v50  ;;  %1947 = vmatmul.mubr.bf16.vlgmr.msra.gmra.mxu1 %v1870_v50 }
 0x6a3   :  { %2038 = vmatpush1.bf16.msra.mxu0 %v3562_v62  ;;  %2081 = vmatpush1.bf16.msra.mxu1 %v3565_v43  ;;  %v4043_v43 = vld [vmem:[#allocation55_spill] sm:$0xff] }
 0x6a4   :  { %2039 = vmatprep.subr.bf16.mxu0 %v3568_v16  ;;  %2082 = vmatprep.subr.bf16.mxu1 %v3571_v21 }
 0x6a5   :  { %2069 = vmatprep.mubr.bf16.mxu0 %v4005_v23  ;;  %2112 = vmatprep.mubr.bf16.mxu1 %v4005_v23 }
 0x6a7   :  { %2040 = vmatpush1.bf16.msra.mxu0 %v3576_v59  ;;  %2083 = vmatpush1.bf16.msra.mxu1 %v3579_v14  ;;  %v4044_v14 = vld [vmem:[#allocation57_spill] sm:$0xff] }
 0x6a8   :  { %2041 = vmatprep.subr.bf16.mxu0 %v3582_v19  ;;  %2084 = vmatprep.subr.bf16.mxu1 %v3585_v27 }
 0x6ab   :  { %2042 = vmatpush1.bf16.msra.mxu0 %v3588_v30  ;;  %2085 = vmatpush1.bf16.msra.mxu1 %v3591_v24 }
 0x6ac   :  { %2043 = vmatprep.subr.bf16.mxu0 %v3594_v28  ;;  %2086 = vmatprep.subr.bf16.mxu1 %v3597_v35  ;;  %v4045_v35 = vld [vmem:[#allocation59_spill] sm:$0xff] }
 0x6af   :  { %2044 = vmatpush1.bf16.msra.mxu0 %v3600_v7  ;;  %2087 = vmatpush1.bf16.msra.mxu1 %v3603_v12 }
 0x6b0   :  { %2045 = vmatprep.subr.bf16.mxu0 %v3606_v25  ;;  %2088 = vmatprep.subr.bf16.mxu1 %v3609_v15 }
 0x6b3   :  { %2046 = vmatpush1.bf16.msra.mxu0 %v3612_v18  ;;  %2089 = vmatpush1.bf16.msra.mxu1 %v3615_v32  ;;  %v4046_v32 = vld [vmem:[#allocation61_spill] sm:$0xff] }
 0x6b4   :  { %2047 = vmatprep.subr.bf16.mxu0 %v3618_v1  ;;  %2090 = vmatprep.subr.bf16.mxu1 %v3621_v0 }
 0x6b7   :  { %2048 = vmatpush1.bf16.msra.mxu0 %v3624_v29  ;;  %2091 = vmatpush1.bf16.msra.mxu1 %v3693_v49  ;;  %v4047_v29 = vld [vmem:[#allocation58_spill] sm:$0xff] }
 0x6b8   :  { %2049 = vmatprep.subr.bf16.mxu0 %v3628_v11  ;;  %2092 = vmatprep.subr.bf16.mxu1 %v3697_v51 }
 0x6bb   :  { %2050 = vmatpush1.bf16.msra.mxu0 %v3700_v58  ;;  %2093 = vmatpush1.bf16.msra.mxu1 %v3703_v5 }
 0x6bc   :  { %2051 = vmatprep.subr.bf16.mxu0 %v3706_v52  ;;  %2094 = vmatprep.subr.bf16.mxu1 %v3709_v4  ;;  %v4048_v52 = vld [vmem:[#allocation62_spill] sm:$0xff] }
 0x6bf   :  { %2052 = vmatpush1.bf16.msra.mxu0 %v3712_v26  ;;  %2095 = vmatpush1.bf16.msra.mxu1 %v3715_v6  ;;  %v4049_v26 = vld [vmem:[#allocation56_spill] sm:$0xff] }
 0x762   :  { %v1905_v23 = vpop.f32.mrf.mxu0  ;;  %v1948_v62 = vpop.f32.mrf.mxu1 }
 0x763   :  { %v1957_v16 = vadd.f32 %v1905_v23, %v4043_v43  ;;  %v1959_v6 = vadd.f32 %v1948_v62, %v4049_v26  ;;  %v2018_v62 = vpop.permute.xlu1 %2017 }
 0x764   :  { %v1907_v21 = vpop.f32.mrf.mxu0  ;;  %v1950_v27 = vpop.f32.mrf.mxu1  ;;  %vm2020_vm14 = vcmp.eq.s32.totalorder %v2018_v62, 1 }
 0x765   :  { %v1965_v59 = vsub.f32 0.0, %v1957_v16  ;;  %v1958_v19 = vadd.f32 %v1907_v21, %v4044_v14  ;;  %v1960_v11 = vadd.f32 %v1950_v27, %v4047_v29 }
 0x766   :  { %v1909_v30 = vpop.f32.mrf.mxu0  ;;  %v1952_v18 = vpop.f32.mrf.mxu1 }
 0x767   :  { %v1967_v24 = vmul.f32 1.442695, %v1965_v59  ;;  %v1975_v28 = vsub.f32 0.0, %v1958_v19  ;;  %v1961_v7 = vadd.f32 %v1909_v30, %v4045_v35  ;;  %v1987_v5 = vsub.f32 0.0, %v1960_v11 }
 0x768   :  { %v1911_v12 = vpop.f32.mrf.mxu0  ;;  %v1954_v51 = vpop.f32.mrf.mxu1  ;;  %v1963_v22 = vadd.f32 %v1952_v18, %v4050_v47  ;;  %v3006_v35 = vmov 0.0   ;;  %v2599_v18 = vld [vmem:[#allocation11] sm:$0xff]  }
 0x769   :  { %2792 = vpow2.f32 %v1967_v24  ;;  %v1977_v25 = vmul.f32 1.442695, %v1975_v28  ;;  %v1966_v15 = vsub.f32 0.0, %v1961_v7  ;;  %v1962_v1 = vadd.f32 %v1911_v12, %v4046_v32  ;;  %2451 = vmatprep.subr.bf16.mxu0 %v3006_v35  ;;  %v2593_v7 = vld [vmem:[#allocation11 + $0x30] sm:$0xff]   ;;  %v2594_v12 = vld [vmem:[#allocation11 + $0x28] sm:$0xff]  }
 0x76a   :  { %v1964_v4 = vadd.f32 %v1954_v51, %v4048_v52  ;;  %v1989_v10 = vmul.f32 1.442695, %v1987_v5  ;;  %v4052_v51 = vld [vmem:[#allocation65_spill] sm:$0xff] }
 0x76b   :  { %2794 = vpow2.f32 %v1977_v25  ;;  %v1969_v0 = vmul.f32 1.442695, %v1966_v15  ;;  %v1976_v49 = vsub.f32 0.0, %v1962_v1  ;;  %v2597_v25 = vld [vmem:[#allocation11 + $0x10] sm:$0xff]   ;;  %v2598_v15 = vld [vmem:[#allocation11 + $0x8] sm:$0xff]  }
 0x76c   :  { %v1988_v13 = vsub.f32 0.0, %v1964_v4 }
 0x76d   :  { %2796 = vpow2.f32 %v1969_v0  ;;  %v1979_v58 = vmul.f32 1.442695, %v1976_v49  ;;  %v4051_v0 = vld [vmem:[#allocation63_spill] sm:$0xff] }
 0x76e   :  { %v1991_v48 = vmul.f32 1.442695, %v1988_v13 }
 0x76f   :  { %2798 = vpow2.f32 %v1979_v58 }
 0x770   :  { %2800 = vtanh.f32 %v1959_v6  ;;  %v4053_v6 = vld [vmem:[#allocation67_spill] sm:$0xff] }
 0x771   :  { %2802 = vpow2.f32 %v1989_v10 }
 0x776   :  { %v2793_v46 = vpop.eup %2792 }
 0x777   :  { %v1971_v57 = vadd.f32 1.0, %v2793_v46 }
 0x778   :  { %v2795_v63 = vpop.eup %2794 }
 0x779   :  { %2804 = vrcp.f32 %v1971_v57  ;;  %v1981_v54 = vadd.f32 1.0, %v2795_v63  ;;  %v4054_v57 = vld [vmem:[#allocation69_spill] sm:$0xff] }
 0x77a   :  { %v2797_v56 = vpop.eup %2796  ;;  %2806 = vtanh.f32 %v1963_v22 }
 0x77b   :  { %2808 = vrcp.f32 %v1981_v54  ;;  %v1972_v61 = vadd.f32 1.0, %v2797_v56  ;;  %v4055_v54 = vld [vmem:[#allocation66_spill] sm:$0xff] }
 0x77c   :  { %2810 = vpow2.f32 %v1991_v48  ;;  %v2799_v20 = vpop.eup %2798 }
 0x77d   :  { %2812 = vrcp.f32 %v1972_v61  ;;  %v1982_v55 = vadd.f32 1.0, %v2799_v20  ;;  %v2801_v8 = vpop.eup %2800 }
 0x77e   :  { %v2803_v17 = vpop.eup %2802 }
 0x77f   :  { %2814 = vrcp.f32 %v1982_v55  ;;  %v1993_v39 = vadd.f32 1.0, %v2803_v17  ;;  %v4056_v17 = vld [vmem:[#allocation70_spill] sm:$0xff] }
 0x781   :  { %2816 = vrcp.f32 %v1993_v39 }
 0x786   :  { %v2805_v9 = vpop.eup %2804 }
 0x787   :  { %v2807_v60 = vpop.eup %2806  ;;  %v1999_v38 = vmul.f32 %v2805_v9, %v2801_v8 }
 0x788   :  { %v2809_v40 = vpop.eup %2808 }
 0x789   :  { %v2811_v41 = vpop.eup %2810  ;;  %v1997_v36 = vmul.f32 %v2809_v40, %v3851_v2 }
 0x78a   :  { %v2813_v42 = vpop.eup %2812  ;;  %v1994_v34 = vadd.f32 1.0, %v2811_v41 }
 0x78b   :  { %v2001_v31 = vadd.f32 %v1999_v38, %v1997_v36  ;;  %v2000_v44 = vmul.f32 %v2813_v42, %v2807_v60  ;;  %v4057_v60 = vld [vmem:[#allocation64_spill] sm:$0xff] }
 0x78c   :  { %v2815_v33 = vpop.eup %2814  ;;  %v4058_v36 = vld [vmem:[#allocation68_spill] sm:$0xff] }
 0x78d   :  { %2818 = vtanh.f32 %v2001_v31  ;;  %v3909_v50 = vsel %vm2019_vm13, %v2001_v31, %v3851_v2  ;;  %v1998_v23 = vmul.f32 %v2815_v33, %v3855_v37 }
 0x78e   :  { %2820 = vrcp.f32 %v1994_v34  ;;  %v2817_v21 = vpop.eup %2816 }
 0x78f   :  { %v2002_v43 = vadd.f32 %v2000_v44, %v1998_v23 }
 0x791   :  { %2822 = vtanh.f32 %v2002_v43  ;;  %v3913_v16 = vsel %vm2020_vm14, %v2002_v43, %v3855_v37  ;;  %v2592_v37 = vld [vmem:[#allocation11 + $0x38] sm:$0xff]  }
 0x79a   :  { %v2819_v59 = vpop.eup %2818 }
 0x79b   :  { %v2005_v14 = vmul.f32 %v2819_v59, %v2817_v21  ;;  %v2821_v19 = vpop.eup %2820 }
 0x79d   :  { %v3917_v2 = vsel %vm2019_vm13, %v2005_v14, %v3859_v53  ;;  %v2595_v53 = vld [vmem:[#allocation11 + $0x20] sm:$0xff]  }
 0x79e   :  { %v2823_v27 = vpop.eup %2822 }
 0x79f   :  { %v2006_v30 = vmul.f32 %v2823_v27, %v2821_v19 }
 0x7a1   :  { %v3920_v24 = vsel %vm2020_vm14, %v2006_v30, %v3862_v3  ;;  %v2596_v3 = vld [vmem:[#allocation11 + $0x18] sm:$0xff]  }
 0x7a2   :  { %v2036_v28 = vpack.c.bf16 %v3920_v24, %v3917_v2 }
 0x7a4   :  { %2070 = vmatmul.mubr.bf16.vlgmr.msra.gmra.mxu0 %v2036_v28  ;;  %2113 = vmatmul.mubr.bf16.vlgmr.msra.gmra.mxu1 %v2036_v28 }
 0x7a5   :  { %2452 = vmatpush3.bf16.msra.mxu0 %v2592_v37  ;;  %2467 = vmatprep.mubr.msk.bf16.mxu0 %vm3007_vm15, %v3006_v35 }
 0x7a6   :  { %2453 = vmatprep.subr.bf16.mxu0 %v3006_v35 }
 0x7a9   :  { %2454 = vmatpush3.bf16.msra.mxu0 %v2593_v7 }
 0x7aa   :  { %2455 = vmatprep.subr.bf16.mxu0 %v3006_v35 }
 0x7ad   :  { %2456 = vmatpush3.bf16.msra.mxu0 %v2594_v12 }
 0x7ae   :  { %2457 = vmatprep.subr.bf16.mxu0 %v3006_v35 }
 0x7b1   :  { %2458 = vmatpush3.bf16.msra.mxu0 %v2595_v53 }
 0x7b2   :  { %2459 = vmatprep.subr.bf16.mxu0 %v3006_v35 }
 0x7b5   :  { %2460 = vmatpush3.bf16.msra.mxu0 %v2596_v3 }
 0x7b6   :  { %2461 = vmatprep.subr.bf16.mxu0 %v3006_v35 }
 0x7b9   :  { %2462 = vmatpush3.bf16.msra.mxu0 %v2597_v25 }
 0x7ba   :  { %2463 = vmatprep.subr.bf16.mxu0 %v3006_v35 }
 0x7bd   :  { %2464 = vmatpush3.bf16.msra.mxu0 %v2598_v15 }
 0x7be   :  { %2465 = vmatprep.subr.bf16.mxu0 %v3006_v35 }
 0x7c1   :  { %2466 = vmatpush3.bf16.msra.mxu0 %v2599_v18 }
 0x864   :  { %v2071_v32 = vpop.f32.mrf.mxu0  ;;  %v2114_v1 = vpop.f32.mrf.mxu1 }
 0x865   :  { %v2123_v29 = vadd.f32 %v2071_v32, %v4051_v0  ;;  %v2125_v38 = vadd.f32 %v2114_v1, %v4057_v60 }
 0x866   :  { %v2073_v11 = vpop.f32.mrf.mxu0  ;;  %v2116_v5 = vpop.f32.mrf.mxu1 }
 0x867   :  { %v2131_v49 = vsub.f32 0.0, %v2123_v29  ;;  %v2124_v58 = vadd.f32 %v2073_v11, %v4052_v51  ;;  %v2126_v56 = vadd.f32 %v2116_v5, %v4055_v54  ;;  %v2181_v11 = vpop.permute.xlu0 %2180 }
 0x868   :  { %v2075_v52 = vpop.f32.mrf.mxu0  ;;  %v2118_v22 = vpop.f32.mrf.mxu1  ;;  %vm2185_vm0 = vcmp.eq.s32.totalorder %v2181_v11, 1 }
 0x869   :  { %v2133_v4 = vmul.f32 1.442695, %v2131_v49  ;;  %v2141_v26 = vsub.f32 0.0, %v2124_v58  ;;  %v2127_v10 = vadd.f32 %v2075_v52, %v4053_v6  ;;  %v2153_v8 = vsub.f32 0.0, %v2126_v56  ;;  %v2184_v49 = vpop.permute.xlu1 %2183 }
 0x86a   :  { %v2077_v13 = vpop.f32.mrf.mxu0  ;;  %v2120_v20 = vpop.f32.mrf.mxu1  ;;  %v2129_v42 = vadd.f32 %v2118_v22, %v4058_v36  ;;  %vm2186_vm1 = vcmp.eq.s32.totalorder %v2184_v49, 1 }
 0x86b   :  { %2824 = vpow2.f32 %v2133_v4  ;;  %v2143_v46 = vmul.f32 1.442695, %v2141_v26  ;;  %v2132_v47 = vsub.f32 0.0, %v2127_v10  ;;  %v2128_v63 = vadd.f32 %v2077_v13, %v4054_v57 }
 0x86c   :  { %v2130_v9 = vadd.f32 %v2120_v20, %v4056_v17  ;;  %v2155_v40 = vmul.f32 1.442695, %v2153_v8 }
 0x86d   :  { %2826 = vpow2.f32 %v2143_v46  ;;  %v2135_v48 = vmul.f32 1.442695, %v2132_v47  ;;  %v2142_v61 = vsub.f32 0.0, %v2128_v63 }
 0x86e   :  { %v2154_v39 = vsub.f32 0.0, %v2130_v9 }
 0x86f   :  { %2828 = vpow2.f32 %v2135_v48  ;;  %v2145_v55 = vmul.f32 1.442695, %v2142_v61 }
 0x870   :  { %v2157_v44 = vmul.f32 1.442695, %v2154_v39 }
 0x871   :  { %2830 = vpow2.f32 %v2145_v55 }
 0x872   :  { %2832 = vtanh.f32 %v2125_v38 }
 0x873   :  { %2834 = vpow2.f32 %v2155_v40 }
 0x878   :  { %v2825_v41 = vpop.eup %2824 }
 0x879   :  { %v2137_v45 = vadd.f32 1.0, %v2825_v41 }
 0x87a   :  { %v2827_v31 = vpop.eup %2826 }
 0x87b   :  { %2836 = vrcp.f32 %v2137_v45  ;;  %v2147_v33 = vadd.f32 1.0, %v2827_v31 }
 0x87c   :  { %v2829_v34 = vpop.eup %2828  ;;  %2838 = vtanh.f32 %v2129_v42 }
 0x87d   :  { %2840 = vrcp.f32 %v2147_v33  ;;  %v2138_v23 = vadd.f32 1.0, %v2829_v34 }
 0x87e   :  { %2842 = vpow2.f32 %v2157_v44  ;;  %v2831_v62 = vpop.eup %2830 }
 0x87f   :  { %2844 = vrcp.f32 %v2138_v23  ;;  %v2148_v43 = vadd.f32 1.0, %v2831_v62  ;;  %v2833_v21 = vpop.eup %2832 }
 0x880   :  { %v2835_v59 = vpop.eup %2834 }
 0x881   :  { %2846 = vrcp.f32 %v2148_v43  ;;  %v2159_v28 = vadd.f32 1.0, %v2835_v59 }
 0x883   :  { %2848 = vrcp.f32 %v2159_v28 }
 0x888   :  { %v2837_v14 = vpop.eup %2836 }
 0x889   :  { %v2839_v19 = vpop.eup %2838  ;;  %v2165_v27 = vmul.f32 %v2837_v14, %v2833_v21 }
 0x88a   :  { %v2841_v30 = vpop.eup %2840 }
 0x88b   :  { %v2843_v37 = vpop.eup %2842  ;;  %v2163_v35 = vmul.f32 %v2841_v30, %v3909_v50 }
 0x88c   :  { %v2845_v7 = vpop.eup %2844  ;;  %v2160_v25 = vadd.f32 1.0, %v2843_v37 }
 0x88d   :  { %v2167_v12 = vadd.f32 %v2165_v27, %v2163_v35  ;;  %v2166_v53 = vmul.f32 %v2845_v7, %v2839_v19 }
 0x88e   :  { %v2847_v3 = vpop.eup %2846 }
 0x88f   :  { %2850 = vtanh.f32 %v2167_v12  ;;  %v2164_v15 = vmul.f32 %v2847_v3, %v3913_v16  ;;  %v2427_v16 = vld [vmem:[%s3948_s6] ss:$0 sm:$0xff] }
 0x890   :  { %2852 = vrcp.f32 %v2160_v25  ;;  %v2849_v32 = vpop.eup %2848 }
 0x891   :  { %v2168_v18 = vadd.f32 %v2166_v53, %v2164_v15 }
 0x893   :  { %2854 = vtanh.f32 %v2168_v18 }
 0x89c   :  { %v2851_v1 = vpop.eup %2850 }
 0x89d   :  { %v2171_v0 = vmul.f32 %v2851_v1, %v2849_v32  ;;  %v2853_v29 = vpop.eup %2852 }
 0x89f   :  { %v2187_v58 = vsel %vm2185_vm0, %v2171_v0, %v3917_v2 }
 0x8a0   :  { %v2855_v51 = vpop.eup %2854 }
 0x8a1   :  { %v2172_v50 = vmul.f32 %v2855_v51, %v2853_v29 }
 0x8a3   :  { %v2188_v5 = vsel %vm2186_vm1, %v2172_v50, %v3920_v24 }
 0x8a4   :  { %v2198_v52 = vpack.c.bf16 %v2188_v5, %v2187_v58 }
 0x8a6   :  { %2468 = vmatmul.mubr.bf16.vlgmr.msra.gmra.mxu0 %v2198_v52 }
 0x966   :  { %v2304_v4 = vpop.f32.mrf.mxu0 }
 0x967   :  { %v2305_v26 = vadd.f32 %v2427_v16, %v2304_v4 }
 0x968   :  { %v2469_v6 = vpop.f32.mrf.mxu0 }
 0x969   :  { %2311 = vst [vmem:[#allocation13] sm:$0xff] %v2305_v26 }
 0x96a   :  { %v2307_v10 = vpop.f32.mrf.mxu0 }
 0x96b   :  { %v2308_v13 = vadd.f32 %v2427_v16, %v2307_v10 }
 0x96c   :  { %v2470_v46 = vpop.f32.mrf.mxu0 }
 0x96d   :  { %2312 = vst [vmem:[#allocation13 + $0x8] sm:$0xff] %v2308_v13 }
 0x96e   :  { %2979 = shalt.err (!%p2976_p10)
}
 0x96f   :  { %s3009_s30 = smov 128   ;;  %s3010_s6 = smov 8  }
 0x970   :  { %2324 = dma.vmem_to_hbm [thread:$0]  %s2319_s28, 256, %s3949_s7, [#allocation7], %s3009_s30, %s3009_s30, %s3010_s6  }
 0x971   :  { %2994 = dma.done.wait [#allocation7], 256  }
 0x972   :  { %2995 = vsyncadd [#allocation7], 4294967040 }
 0x973   :  { %2328 = vsyncpa [#allocation6], 1 }
 0x974   :  { %2329 = vsyncpa [#allocation9], 1 }
 0x975   :  { %2330 = vsyncpa [#allocation12], 1 }
 0x976   :  { %2331 = vsyncpa [#allocation7], 1 }

</bundles_post_ra>
